<compile_context>
chip_gen: v7x
topology: tpu7x:2x2x1
jax: 0.10.0
libtpu: 0.0.40
codegen_flags: <defaults>
</compile_context>

<pallas_src>
import jax
import jax.numpy as jnp
from jax import lax
from jax.experimental import pallas as pl
from jax.experimental.pallas import tpu as pltpu


def mmmv_forward(x_s1, x_s2, w_s1, b_s1, w_s2, b_s2):
    """x_*: NCHW images [B, Cin, H, W]; w_*: [Cout, Cin, 3, 3]; b_*: [Cout]."""
    B, Cin, H, W = x_s1.shape
    Cout = w_s1.shape[0]
    Hp, Wp = H + 2, W + 2
    S = 2  # number of sources
    inv_hw = 1.0 / float(H * W)
    eps2 = 1e-24  # (F.normalize eps = 1e-12) ** 2

    # ---- wrapper-side (cheap) layout prep -------------------------------
    def prep_img(x):
        xp = jnp.pad(x, ((0, 0), (0, 0), (1, 1), (1, 1)))      # spatial pad 1
        return jnp.transpose(xp, (0, 2, 3, 1))                 # NCHW -> NHWC

    # [S*B, Hp, Wp, Cin]  (f32; cast to bf16 inside the kernel at the MXU)
    x_all = jnp.stack([prep_img(x_s1), prep_img(x_s2)], axis=0)
    x_all = x_all.reshape(S * B, Hp, Wp, Cin).astype(jnp.float32)

    def prep_w(w):  # [Cout, Cin, 3, 3] -> [9, Cin, Cout], tap t = dy*3 + dx
        return jnp.transpose(w, (2, 3, 1, 0)).reshape(9, Cin, Cout)

    w_all = jnp.stack([prep_w(w_s1), prep_w(w_s2)], axis=0).astype(jnp.bfloat16)
    b_all = jnp.stack([b_s1, b_s2], axis=0).reshape(S, 1, Cout).astype(jnp.float32)

    # ---- fused kernel ---------------------------------------------------
    def kernel(x_ref, w_ref, b_ref, o_ref):
        # x_ref: [1, Hp, Wp, Cin] f32   (one (source, batch) image, padded)
        # w_ref: [1, 9, Cin, Cout] bf16 (per-tap conv weights of this source)
        # b_ref: [1, 1, Cout] f32
        # o_ref: [1, 1, Cout] f32       (resident across the source axis)
        s = pl.program_id(1)

        ws = w_ref[0]                                   # [9, Cin, Cout] bf16
        acc = jnp.zeros((H * W, Cout), jnp.float32)
        # 3x3 "same" conv = 9 shifted-slice matmuls, bf16 MXU / f32 accumulate.
        for t in range(9):
            dy, dx = t // 3, t % 3
            lhs = x_ref[0, dy:dy + H, dx:dx + W, :]     # [H, W, Cin] f32
            lhs = lhs.reshape(H * W, Cin).astype(jnp.bfloat16)
            acc = acc + jnp.dot(lhs, ws[t],
                                preferred_element_type=jnp.float32)

        # bias + ReLU + global average pool (all f32)
        act = jnp.maximum(acc + b_ref[0], 0.0)          # [H*W, Cout]
        pooled = (jnp.sum(act, axis=0, keepdims=True) * inv_hw)
        pooled = pooled.reshape(1, 1, Cout)

        # fusion = "Add": accumulate per-source features in the output block.
        @pl.when(s == 0)
        def _init():
            o_ref[...] = jnp.zeros_like(o_ref)

        o_ref[...] = o_ref[...] + pooled

        # F.normalize(x, p=2, dim=1) at the last source.
        @pl.when(s == pl.num_programs(1) - 1)
        def _finalize():
            fused = o_ref[...]
            ssq = jnp.sum(fused * fused, axis=-1, keepdims=True)
            o_ref[...] = fused * lax.rsqrt(jnp.maximum(ssq, eps2))

    out = pl.pallas_call(
        kernel,
        out_shape=jax.ShapeDtypeStruct((B, 1, Cout), jnp.float32),
        grid_spec=pltpu.PrefetchScalarGridSpec(
            num_scalar_prefetch=0,
            grid=(B, S),  # batch (parallel) x source (reduction, trailing)
            in_specs=[
                pl.BlockSpec((1, Hp, Wp, Cin), lambda b, s: (s * B + b, 0, 0, 0)),
                pl.BlockSpec((1, 9, Cin, Cout), lambda b, s: (s, 0, 0, 0)),
                pl.BlockSpec((1, 1, Cout), lambda b, s: (s, 0, 0)),
            ],
            out_specs=pl.BlockSpec((1, 1, Cout), lambda b, s: (b, 0, 0)),
        ),
        compiler_params=pltpu.CompilerParams(
            dimension_semantics=("parallel", "arbitrary")),
    )(x_all, w_all, b_all)

    return out.reshape(B, Cout)


def mmmv_reference(x_s1, x_s2, w_s1, b_s1, w_s2, b_s2):
    """Pure-JAX f32 reference of the same synthetic MMMV forward."""
    def backbone(x, w, b):
        y = lax.conv_general_dilated(
            x, w, window_strides=(1, 1), padding="SAME",
            dimension_numbers=("NCHW", "OIHW", "NCHW"),
            precision=lax.Precision.HIGHEST)
        y = jnp.maximum(y + b[None, :, None, None], 0.0)
        return jnp.mean(y, axis=(2, 3))                  # [B, Cout]

    fused = backbone(x_s1, w_s1, b_s1) + backbone(x_s2, w_s2, b_s2)
    norm = jnp.sqrt(jnp.sum(fused * fused, axis=1, keepdims=True))
    return fused / jnp.maximum(norm, 1e-12)


if __name__ == "__main__":
    # Small shapes consistent with the module's forward:
    # batch=2, in_channels=4, spatial=16x16, backbone_out_channels=32.
    B, Cin, H, W = 2, 4, 16, 16
    Cout = 32

    key = jax.random.PRNGKey(0)
    k_x1, k_x2, k_w1, k_b1, k_w2, k_b2 = jax.random.split(key, 6)

    x_s1 = jax.random.normal(k_x1, (B, Cin, H, W), dtype=jnp.float32)
    x_s2 = jax.random.normal(k_x2, (B, Cin, H, W), dtype=jnp.float32)

    # Deterministic synthetic backbone parameters (one conv per source).
    w_s1 = 0.1 * jax.random.normal(k_w1, (Cout, Cin, 3, 3), dtype=jnp.float32)
    b_s1 = 0.01 * jax.random.normal(k_b1, (Cout,), dtype=jnp.float32)
    w_s2 = 0.1 * jax.random.normal(k_w2, (Cout, Cin, 3, 3), dtype=jnp.float32)
    b_s2 = 0.01 * jax.random.normal(k_b2, (Cout,), dtype=jnp.float32)

    fwd = jax.jit(mmmv_forward)
    out = jax.block_until_ready(fwd(x_s1, x_s2, w_s1, b_s1, w_s2, b_s2))

    assert out.shape == (B, Cout)
    assert bool(jnp.all(jnp.isfinite(out)))

    # L2 norm along dim 1 should be ~1 after F.normalize.
    norms = jnp.sqrt(jnp.sum(out * out, axis=1))
    assert bool(jnp.all(jnp.abs(norms - 1.0) < 1e-4))

    # Match the f32 reference within bf16-matmul tolerance.
    ref = mmmv_reference(x_s1, x_s2, w_s1, b_s1, w_s2, b_s2)
    max_abs_err = float(jnp.max(jnp.abs(out - ref)))
    assert max_abs_err < 3e-2, f"max abs err vs reference: {max_abs_err}"

    print("KERNEL_OK")
</pallas_src>

<mosaic_0001>
module attributes {stable_mosaic.version = 11 : i64} {
  func.func @kernel(%arg0: i32, %arg1: i32, %arg2: memref<1x18x18x4xf32, #tpu.memory_space<vmem>>, %arg3: memref<1x9x4x32xbf16, #tpu.memory_space<vmem>>, %arg4: memref<1x1x32xf32, #tpu.memory_space<vmem>>, %arg5: memref<1x1x32xf32, #tpu.memory_space<vmem>>) attributes {dimension_semantics = [#tpu.dimension_semantics<parallel>, #tpu.dimension_semantics<arbitrary>], iteration_bounds = array<i64: 2, 2>, scalar_prefetch = 0 : i64, scratch_operands = 0 : i64, tpu.core_type = #tpu.core_type<tc>, window_params = [{transform_indices = @transform_0, window_bounds = array<i64: 1, 18, 18, 4>}, {transform_indices = @transform_1, window_bounds = array<i64: 1, 9, 4, 32>}, {transform_indices = @transform_2, window_bounds = array<i64: 1, 1, 32>}, {transform_indices = @transform_3, window_bounds = array<i64: 1, 1, 32>}]} {
    %c0 = arith.constant 0 : index
    %c0_0 = arith.constant 0 : index
    %c0_1 = arith.constant 0 : index
    %c0_2 = arith.constant 0 : index
    %0 = vector.load %arg3[%c0, %c0_0, %c0_1, %c0_2] : memref<1x9x4x32xbf16, #tpu.memory_space<vmem>>, vector<1x9x4x32xbf16>
    %1 = vector.shape_cast %0 : vector<1x9x4x32xbf16> to vector<9x4x32xbf16>
    %cst = arith.constant 0.000000e+00 : f32
    %2 = vector.broadcast %cst : f32 to vector<256x32xf32>
    %c0_3 = arith.constant 0 : index
    %c0_4 = arith.constant 0 : index
    %c0_5 = arith.constant 0 : index
    %c0_6 = arith.constant 0 : index
    %3 = vector.load %arg2[%c0_3, %c0_4, %c0_5, %c0_6] : memref<1x18x18x4xf32, #tpu.memory_space<vmem>>, vector<1x16x16x4xf32>
    %4 = vector.shape_cast %3 : vector<1x16x16x4xf32> to vector<16x16x4xf32>
    %5 = vector.shape_cast %4 : vector<16x16x4xf32> to vector<256x4xf32>
    %6 = arith.truncf %5 : vector<256x4xf32> to vector<256x4xbf16>
    %7 = vector.extract_strided_slice %1 {offsets = [0, 0, 0], sizes = [1, 4, 32], strides = [1, 1, 1]} : vector<9x4x32xbf16> to vector<1x4x32xbf16>
    %8 = vector.shape_cast %7 : vector<1x4x32xbf16> to vector<4x32xbf16>
    %cst_7 = arith.constant dense<0.000000e+00> : vector<256x32xf32>
    %9 = tpu.matmul %6, %8, %cst_7 {dimension_numbers = #tpu.dot_dimension_numbers<[1], [0], [0], [1], [0, 0, 1, 1], [], []>} : vector<256x4xbf16>, vector<4x32xbf16>, vector<256x32xf32> -> vector<256x32xf32>
    %10 = arith.addf %2, %9 : vector<256x32xf32>
    %c0_8 = arith.constant 0 : index
    %c0_9 = arith.constant 0 : index
    %c1 = arith.constant 1 : index
    %c0_10 = arith.constant 0 : index
    %11 = vector.load %arg2[%c0_8, %c0_9, %c1, %c0_10] : memref<1x18x18x4xf32, #tpu.memory_space<vmem>>, vector<1x16x16x4xf32>
    %12 = vector.shape_cast %11 : vector<1x16x16x4xf32> to vector<16x16x4xf32>
    %13 = vector.shape_cast %12 : vector<16x16x4xf32> to vector<256x4xf32>
    %14 = arith.truncf %13 : vector<256x4xf32> to vector<256x4xbf16>
    %15 = vector.extract_strided_slice %1 {offsets = [1, 0, 0], sizes = [1, 4, 32], strides = [1, 1, 1]} : vector<9x4x32xbf16> to vector<1x4x32xbf16>
    %16 = vector.shape_cast %15 : vector<1x4x32xbf16> to vector<4x32xbf16>
    %cst_11 = arith.constant dense<0.000000e+00> : vector<256x32xf32>
    %17 = tpu.matmul %14, %16, %cst_11 {dimension_numbers = #tpu.dot_dimension_numbers<[1], [0], [0], [1], [0, 0, 1, 1], [], []>} : vector<256x4xbf16>, vector<4x32xbf16>, vector<256x32xf32> -> vector<256x32xf32>
    %18 = arith.addf %10, %17 : vector<256x32xf32>
    %c0_12 = arith.constant 0 : index
    %c0_13 = arith.constant 0 : index
    %c2 = arith.constant 2 : index
    %c0_14 = arith.constant 0 : index
    %19 = vector.load %arg2[%c0_12, %c0_13, %c2, %c0_14] : memref<1x18x18x4xf32, #tpu.memory_space<vmem>>, vector<1x16x16x4xf32>
    %20 = vector.shape_cast %19 : vector<1x16x16x4xf32> to vector<16x16x4xf32>
    %21 = vector.shape_cast %20 : vector<16x16x4xf32> to vector<256x4xf32>
    %22 = arith.truncf %21 : vector<256x4xf32> to vector<256x4xbf16>
    %23 = vector.extract_strided_slice %1 {offsets = [2, 0, 0], sizes = [1, 4, 32], strides = [1, 1, 1]} : vector<9x4x32xbf16> to vector<1x4x32xbf16>
    %24 = vector.shape_cast %23 : vector<1x4x32xbf16> to vector<4x32xbf16>
    %cst_15 = arith.constant dense<0.000000e+00> : vector<256x32xf32>
    %25 = tpu.matmul %22, %24, %cst_15 {dimension_numbers = #tpu.dot_dimension_numbers<[1], [0], [0], [1], [0, 0, 1, 1], [], []>} : vector<256x4xbf16>, vector<4x32xbf16>, vector<256x32xf32> -> vector<256x32xf32>
    %26 = arith.addf %18, %25 : vector<256x32xf32>
    %c0_16 = arith.constant 0 : index
    %c1_17 = arith.constant 1 : index
    %c0_18 = arith.constant 0 : index
    %c0_19 = arith.constant 0 : index
    %27 = vector.load %arg2[%c0_16, %c1_17, %c0_18, %c0_19] : memref<1x18x18x4xf32, #tpu.memory_space<vmem>>, vector<1x16x16x4xf32>
    %28 = vector.shape_cast %27 : vector<1x16x16x4xf32> to vector<16x16x4xf32>
    %29 = vector.shape_cast %28 : vector<16x16x4xf32> to vector<256x4xf32>
    %30 = arith.truncf %29 : vector<256x4xf32> to vector<256x4xbf16>
    %31 = vector.extract_strided_slice %1 {offsets = [3, 0, 0], sizes = [1, 4, 32], strides = [1, 1, 1]} : vector<9x4x32xbf16> to vector<1x4x32xbf16>
    %32 = vector.shape_cast %31 : vector<1x4x32xbf16> to vector<4x32xbf16>
    %cst_20 = arith.constant dense<0.000000e+00> : vector<256x32xf32>
    %33 = tpu.matmul %30, %32, %cst_20 {dimension_numbers = #tpu.dot_dimension_numbers<[1], [0], [0], [1], [0, 0, 1, 1], [], []>} : vector<256x4xbf16>, vector<4x32xbf16>, vector<256x32xf32> -> vector<256x32xf32>
    %34 = arith.addf %26, %33 : vector<256x32xf32>
    %c0_21 = arith.constant 0 : index
    %c1_22 = arith.constant 1 : index
    %c1_23 = arith.constant 1 : index
    %c0_24 = arith.constant 0 : index
    %35 = vector.load %arg2[%c0_21, %c1_22, %c1_23, %c0_24] : memref<1x18x18x4xf32, #tpu.memory_space<vmem>>, vector<1x16x16x4xf32>
    %36 = vector.shape_cast %35 : vector<1x16x16x4xf32> to vector<16x16x4xf32>
    %37 = vector.shape_cast %36 : vector<16x16x4xf32> to vector<256x4xf32>
    %38 = arith.truncf %37 : vector<256x4xf32> to vector<256x4xbf16>
    %39 = vector.extract_strided_slice %1 {offsets = [4, 0, 0], sizes = [1, 4, 32], strides = [1, 1, 1]} : vector<9x4x32xbf16> to vector<1x4x32xbf16>
    %40 = vector.shape_cast %39 : vector<1x4x32xbf16> to vector<4x32xbf16>
    %cst_25 = arith.constant dense<0.000000e+00> : vector<256x32xf32>
    %41 = tpu.matmul %38, %40, %cst_25 {dimension_numbers = #tpu.dot_dimension_numbers<[1], [0], [0], [1], [0, 0, 1, 1], [], []>} : vector<256x4xbf16>, vector<4x32xbf16>, vector<256x32xf32> -> vector<256x32xf32>
    %42 = arith.addf %34, %41 : vector<256x32xf32>
    %c0_26 = arith.constant 0 : index
    %c1_27 = arith.constant 1 : index
    %c2_28 = arith.constant 2 : index
    %c0_29 = arith.constant 0 : index
    %43 = vector.load %arg2[%c0_26, %c1_27, %c2_28, %c0_29] : memref<1x18x18x4xf32, #tpu.memory_space<vmem>>, vector<1x16x16x4xf32>
    %44 = vector.shape_cast %43 : vector<1x16x16x4xf32> to vector<16x16x4xf32>
    %45 = vector.shape_cast %44 : vector<16x16x4xf32> to vector<256x4xf32>
    %46 = arith.truncf %45 : vector<256x4xf32> to vector<256x4xbf16>
    %47 = vector.extract_strided_slice %1 {offsets = [5, 0, 0], sizes = [1, 4, 32], strides = [1, 1, 1]} : vector<9x4x32xbf16> to vector<1x4x32xbf16>
    %48 = vector.shape_cast %47 : vector<1x4x32xbf16> to vector<4x32xbf16>
    %cst_30 = arith.constant dense<0.000000e+00> : vector<256x32xf32>
    %49 = tpu.matmul %46, %48, %cst_30 {dimension_numbers = #tpu.dot_dimension_numbers<[1], [0], [0], [1], [0, 0, 1, 1], [], []>} : vector<256x4xbf16>, vector<4x32xbf16>, vector<256x32xf32> -> vector<256x32xf32>
    %50 = arith.addf %42, %49 : vector<256x32xf32>
    %c0_31 = arith.constant 0 : index
    %c2_32 = arith.constant 2 : index
    %c0_33 = arith.constant 0 : index
    %c0_34 = arith.constant 0 : index
    %51 = vector.load %arg2[%c0_31, %c2_32, %c0_33, %c0_34] : memref<1x18x18x4xf32, #tpu.memory_space<vmem>>, vector<1x16x16x4xf32>
    %52 = vector.shape_cast %51 : vector<1x16x16x4xf32> to vector<16x16x4xf32>
    %53 = vector.shape_cast %52 : vector<16x16x4xf32> to vector<256x4xf32>
    %54 = arith.truncf %53 : vector<256x4xf32> to vector<256x4xbf16>
    %55 = vector.extract_strided_slice %1 {offsets = [6, 0, 0], sizes = [1, 4, 32], strides = [1, 1, 1]} : vector<9x4x32xbf16> to vector<1x4x32xbf16>
    %56 = vector.shape_cast %55 : vector<1x4x32xbf16> to vector<4x32xbf16>
    %cst_35 = arith.constant dense<0.000000e+00> : vector<256x32xf32>
    %57 = tpu.matmul %54, %56, %cst_35 {dimension_numbers = #tpu.dot_dimension_numbers<[1], [0], [0], [1], [0, 0, 1, 1], [], []>} : vector<256x4xbf16>, vector<4x32xbf16>, vector<256x32xf32> -> vector<256x32xf32>
    %58 = arith.addf %50, %57 : vector<256x32xf32>
    %c0_36 = arith.constant 0 : index
    %c2_37 = arith.constant 2 : index
    %c1_38 = arith.constant 1 : index
    %c0_39 = arith.constant 0 : index
    %59 = vector.load %arg2[%c0_36, %c2_37, %c1_38, %c0_39] : memref<1x18x18x4xf32, #tpu.memory_space<vmem>>, vector<1x16x16x4xf32>
    %60 = vector.shape_cast %59 : vector<1x16x16x4xf32> to vector<16x16x4xf32>
    %61 = vector.shape_cast %60 : vector<16x16x4xf32> to vector<256x4xf32>
    %62 = arith.truncf %61 : vector<256x4xf32> to vector<256x4xbf16>
    %63 = vector.extract_strided_slice %1 {offsets = [7, 0, 0], sizes = [1, 4, 32], strides = [1, 1, 1]} : vector<9x4x32xbf16> to vector<1x4x32xbf16>
    %64 = vector.shape_cast %63 : vector<1x4x32xbf16> to vector<4x32xbf16>
    %cst_40 = arith.constant dense<0.000000e+00> : vector<256x32xf32>
    %65 = tpu.matmul %62, %64, %cst_40 {dimension_numbers = #tpu.dot_dimension_numbers<[1], [0], [0], [1], [0, 0, 1, 1], [], []>} : vector<256x4xbf16>, vector<4x32xbf16>, vector<256x32xf32> -> vector<256x32xf32>
    %66 = arith.addf %58, %65 : vector<256x32xf32>
    %c0_41 = arith.constant 0 : index
    %c2_42 = arith.constant 2 : index
    %c2_43 = arith.constant 2 : index
    %c0_44 = arith.constant 0 : index
    %67 = vector.load %arg2[%c0_41, %c2_42, %c2_43, %c0_44] : memref<1x18x18x4xf32, #tpu.memory_space<vmem>>, vector<1x16x16x4xf32>
    %68 = vector.shape_cast %67 : vector<1x16x16x4xf32> to vector<16x16x4xf32>
    %69 = vector.shape_cast %68 : vector<16x16x4xf32> to vector<256x4xf32>
    %70 = arith.truncf %69 : vector<256x4xf32> to vector<256x4xbf16>
    %71 = vector.extract_strided_slice %1 {offsets = [8, 0, 0], sizes = [1, 4, 32], strides = [1, 1, 1]} : vector<9x4x32xbf16> to vector<1x4x32xbf16>
    %72 = vector.shape_cast %71 : vector<1x4x32xbf16> to vector<4x32xbf16>
    %cst_45 = arith.constant dense<0.000000e+00> : vector<256x32xf32>
    %73 = tpu.matmul %70, %72, %cst_45 {dimension_numbers = #tpu.dot_dimension_numbers<[1], [0], [0], [1], [0, 0, 1, 1], [], []>} : vector<256x4xbf16>, vector<4x32xbf16>, vector<256x32xf32> -> vector<256x32xf32>
    %74 = arith.addf %66, %73 : vector<256x32xf32>
    %c0_46 = arith.constant 0 : index
    %c0_47 = arith.constant 0 : index
    %c0_48 = arith.constant 0 : index
    %75 = vector.load %arg4[%c0_46, %c0_47, %c0_48] : memref<1x1x32xf32, #tpu.memory_space<vmem>>, vector<1x1x32xf32>
    %76 = vector.shape_cast %75 : vector<1x1x32xf32> to vector<1x32xf32>
    %77 = vector.broadcast %76 : vector<1x32xf32> to vector<256x32xf32>
    %78 = arith.addf %74, %77 : vector<256x32xf32>
    %cst_49 = arith.constant 0.000000e+00 : f32
    %79 = vector.broadcast %cst_49 : f32 to vector<256x32xf32>
    %80 = arith.maximumf %78, %79 : vector<256x32xf32>
    %cst_50 = arith.constant dense<0.000000e+00> : vector<32xf32>
    %81 = vector.multi_reduction <add>, %80, %cst_50 [0] : vector<256x32xf32> to vector<32xf32>
    %82 = vector.shape_cast %81 : vector<32xf32> to vector<1x32xf32>
    %cst_51 = arith.constant 3.906250e-03 : f32
    %83 = vector.broadcast %cst_51 : f32 to vector<1x32xf32>
    %84 = arith.mulf %82, %83 : vector<1x32xf32>
    %85 = vector.shape_cast %84 : vector<1x32xf32> to vector<1x1x32xf32>
    %c0_i32 = arith.constant 0 : i32
    %86 = arith.cmpi eq, %arg1, %c0_i32 : i32
    %87 = arith.extui %86 : i1 to i32
    %c0_i32_52 = arith.constant 0 : i32
    %88 = arith.cmpi ne, %87, %c0_i32_52 : i32
    scf.if %88 {
      %cst_60 = arith.constant 0.000000e+00 : f32
      %95 = vector.broadcast %cst_60 : f32 to vector<1x1x32xf32>
      %c0_61 = arith.constant 0 : index
      %c0_62 = arith.constant 0 : index
      %c0_63 = arith.constant 0 : index
      %96 = vector.load %arg5[%c0_61, %c0_62, %c0_63] : memref<1x1x32xf32, #tpu.memory_space<vmem>>, vector<1x1x32xf32>
      tpu.vector_store %arg5[%c0_61, %c0_62, %c0_63], %95 {strides = array<i32>} : memref<1x1x32xf32, #tpu.memory_space<vmem>>, vector<1x1x32xf32>,
    } else {
    }
    %c0_53 = arith.constant 0 : index
    %c0_54 = arith.constant 0 : index
    %c0_55 = arith.constant 0 : index
    %89 = vector.load %arg5[%c0_53, %c0_54, %c0_55] : memref<1x1x32xf32, #tpu.memory_space<vmem>>, vector<1x1x32xf32>
    %90 = arith.addf %89, %85 : vector<1x1x32xf32>
    %c0_56 = arith.constant 0 : index
    %c0_57 = arith.constant 0 : index
    %c0_58 = arith.constant 0 : index
    %91 = vector.load %arg5[%c0_56, %c0_57, %c0_58] : memref<1x1x32xf32, #tpu.memory_space<vmem>>, vector<1x1x32xf32>
    tpu.vector_store %arg5[%c0_56, %c0_57, %c0_58], %90 {strides = array<i32>} : memref<1x1x32xf32, #tpu.memory_space<vmem>>, vector<1x1x32xf32>,
    %c1_i32 = arith.constant 1 : i32
    %92 = arith.cmpi eq, %arg1, %c1_i32 : i32
    %93 = arith.extui %92 : i1 to i32
    %c0_i32_59 = arith.constant 0 : i32
    %94 = arith.cmpi ne, %93, %c0_i32_59 : i32
    scf.if %94 {
      %c0_60 = arith.constant 0 : index
      %c0_61 = arith.constant 0 : index
      %c0_62 = arith.constant 0 : index
      %95 = vector.load %arg5[%c0_60, %c0_61, %c0_62] : memref<1x1x32xf32, #tpu.memory_space<vmem>>, vector<1x1x32xf32>
      %96 = arith.mulf %95, %95 : vector<1x1x32xf32>
      %cst_63 = arith.constant dense<0.000000e+00> : vector<1x1xf32>
      %97 = vector.multi_reduction <add>, %96, %cst_63 [2] : vector<1x1x32xf32> to vector<1x1xf32>
      %98 = vector.shape_cast %97 : vector<1x1xf32> to vector<1x1x1xf32>
      %cst_64 = arith.constant 1.000000e-24 : f32
      %99 = vector.broadcast %cst_64 : f32 to vector<1x1x1xf32>
      %100 = arith.maximumf %98, %99 : vector<1x1x1xf32>
      %101 = math.rsqrt %100 : vector<1x1x1xf32>
      %102 = vector.broadcast %101 : vector<1x1x1xf32> to vector<1x1x32xf32>
      %103 = arith.mulf %95, %102 : vector<1x1x32xf32>
      %c0_65 = arith.constant 0 : index
      %c0_66 = arith.constant 0 : index
      %c0_67 = arith.constant 0 : index
      %104 = vector.load %arg5[%c0_65, %c0_66, %c0_67] : memref<1x1x32xf32, #tpu.memory_space<vmem>>, vector<1x1x32xf32>
      tpu.vector_store %arg5[%c0_65, %c0_66, %c0_67], %103 {strides = array<i32>} : memref<1x1x32xf32, #tpu.memory_space<vmem>>, vector<1x1x32xf32>,
    } else {
    }
    return
  }
  func.func @transform_0(%arg0: i32, %arg1: i32) -> (i32, i32, i32, i32) {
    %c2_i32 = arith.constant 2 : i32
    %0 = arith.muli %arg1, %c2_i32 : i32
    %1 = arith.addi %0, %arg0 : i32
    %c0_i32 = arith.constant 0 : i32
    %c0_i32_0 = arith.constant 0 : i32
    %c0_i32_1 = arith.constant 0 : i32
    %c0_i32_2 = arith.constant 0 : i32
    return %1, %c0_i32, %c0_i32_0, %c0_i32_1 : i32, i32, i32, i32
  }
  func.func @transform_1(%arg0: i32, %arg1: i32) -> (i32, i32, i32, i32) {
    %c0_i32 = arith.constant 0 : i32
    %c0_i32_0 = arith.constant 0 : i32
    %c0_i32_1 = arith.constant 0 : i32
    %c0_i32_2 = arith.constant 0 : i32
    return %arg1, %c0_i32, %c0_i32_0, %c0_i32_1 : i32, i32, i32, i32
  }
  func.func @transform_2(%arg0: i32, %arg1: i32) -> (i32, i32, i32) {
    %c0_i32 = arith.constant 0 : i32
    %c0_i32_0 = arith.constant 0 : i32
    %c0_i32_1 = arith.constant 0 : i32
    return %arg1, %c0_i32, %c0_i32_0 : i32, i32, i32
  }
  func.func @transform_3(%arg0: i32, %arg1: i32) -> (i32, i32, i32) {
    %c0_i32 = arith.constant 0 : i32
    %c0_i32_0 = arith.constant 0 : i32
    %c0_i32_1 = arith.constant 0 : i32
    return %arg0, %c0_i32, %c0_i32_0 : i32, i32, i32
  }
}

</mosaic_0001>

<bundles_post_ra>
// kernel: mmmv_forward.1
= control target key start
LH: loop header
LB: loop body
LE: loop exit
PB: predicated region body
PF: predicated region fallthrough
CT: control target
= control target key end

     0   :  { %8 = vsyncpa [#allocation3], 0  ;;  %s5097_s0 = inlined_call_operand.vmem [shape: f32[4,18,18,4], index: 0, kind: input, shape index: {}]   ;;  %s5098_s1 = inlined_call_operand.vmem [shape: bf16[2,9,4,32], index: 1, kind: input, shape index: {}]   ;;  %s5099_s2 = inlined_call_operand.vmem [shape: f32[2,1,32], index: 2, kind: input, shape index: {}]   ;;  %s5100_s3 = inlined_call_operand.hbm [shape: f32[2,1,32], index: 3, kind: output, shape index: {}]  }
   0x1   :  { %10 = vsyncpa [#allocation3 + $0x1], 0  ;;  %s4344_s12 = smov 0   ;;  %s4346_s13 = smov 0  }
   0x2   :  { %s4348_s14 = smov 0   ;;  %s4350_s15 = smov 0  }
   0x3   :  { %s4352_s16 = smov 0   ;;  %s4354_s17 = smov 0  }
   0x4   :  { %s4356_s18 = smov 0   ;;  %s4358_s19 = smov 0  }
   0x5 LB: > { %s3071_s20 = sadd.s32 4294967295, %s4320_s19   ;;  %s3072_s21 = sadd.s32 4294967294, %s4320_s19   ;;  %s4320_s19 = sphi %s4358_s19, %s16_s19   ;;  %s4316_s18 = sphi %s4356_s18, %s5109_s18   ;;  %s4312_s17 = sphi %s4354_s17, %s5108_s17   ;;  %s4308_s16 = sphi %s4352_s16, %s5107_s16   ;;  %s4304_s15 = sphi %s4350_s15, %s5106_s15   ;;  %s4300_s14 = sphi %s4348_s14, %s5105_s14   ;;  %s4296_s13 = sphi %s4346_s13, %s5104_s13   ;;  %s4292_s12 = sphi %s4344_s12, %s5103_s12  }
   0x6   : > { %s25_s22 = sadd.s32 1, %s4312_s17  ;;  %s28_s23 = sadd.s32 1, %s4316_s18 }
   0x7   : > { %p26_p0 = scmp.ge.s32.totalorder %s25_s22, 2  ;;  %p127_p1 = scmp.ne.s32.totalorder %s4300_s14, %s4296_s13 }
   0x8   : > { %p128_p2 = scmp.eq.s32.totalorder %s3071_s20, 3  ;;  %p133_p4 = scmp.ne.s32.totalorder %s4296_s13, %s4292_s12 }
   0x9   : > { %s5111_s22 = smov (%p26_p0, %s25_s22), 0  ;;  %s5113_s23 = smov (!%p26_p0, %s28_s23), %s4316_s18 }
   0xa   : > { %p4393_p3 = por %p128_p2, %p127_p1  ;;  %p30_p5 = scmp.ge.s32.totalorder %s5113_s23, 2 }
   0xb   : > { %p134_p6 = scmp.eq.s32.totalorder %s3072_s21, 3  ;;  %p3077_p7 = scmp.ge.s32.totalorder %s4320_s19, 1 }
   0xc   : > { %p178_p8 = scmp.lt.s32.totalorder %s4320_s19, 5  ;;  %s5115_s23 = smov (%p30_p5, %s5113_s23), 0 }
   0xd   : > { %p4403_p9 = por %p134_p6, %p133_p4  ;;  %s114_s26 = ssub.s32 %s4316_s18, %s5115_s23 }
   0xe   : > { %p179_p10 = pnand %p3077_p7, %p178_p8  ;;  %s117_s27 = sadd.s32 1, %s4300_s14 }
   0xf   : > { %p115_p11 = scmp.eq.s32.totalorder %s114_s26, 0  ;;  %s209_s29 = sand.u32 (!%p179_p10), 1, %s4296_s13   ;;  %vm383_vm0 = vcmask (!%p179_p10), 1041408   ;;  %vm334_vm1 = vcmask (!%p179_p10), 31744   ;;  %vm2877_vm2 = vcmask (!%p179_p10), 261120  }
  0x10   : > { %182 = sbr.rel (%p179_p10) target bundleno = 751 (0x2ef), region = 32  ;;  %p220_p12 = scmp.lt.s32.totalorder (!%p179_p10), %s4304_s15, 1 }
  0x11   : > { %s4411_s28 = scalar_select %p115_p11, %s4300_s14, %s117_s27  }
  0x12   : > { %s3078_s30 = sshll.u32 (!%p179_p10), %s4304_s15, 1  ;;  %p3418_p0 = scmp.ne.s32.totalorder (!%p179_p10), %s4304_s15, 0 }
  0x13   : > { %s212_s5 = sadd.s32 (!%p179_p10), %s4308_s16, %s3078_s30 }
  0x14   : > { %p213_p13 = scmp.lt.s32.totalorder (!%p179_p10), %s212_s5, 3 }
  0x17   : > { %s4417_s4 = scalar_select %p220_p12, %s4304_s15, 1 }
  0x18   : > { %s5117_s5 = smov (!%p213_p13, %s212_s5), 3  ;;  %vm2952_vm3 = vcmask (!%p3418_p0), 253952  }
  0x19   : > { %s4151_s6 = smul.u32 18, %s4417_s4  ;;  %s227_s30 = scalar_lea.vmem %s5099_s2, %s4417_s4 }
  0x1a   : > { %s4150_s10 = smul.u32 432, %s5117_s5  ;;  %s210_s4 = scalar_lea.vmem [#allocation2], %s209_s29 }
  0x1b   : > { %s4424_s9 = scalar_lea.vmem %s5098_s1, %s4151_s6 }
  0x1c   : > { %v230_v0 = vld [vmem:[%s4424_s9 + $0x2] sm:$0x3]  ;;  %v4428_v1 = vld [vmem:[%s4424_s9 + $0x8] sm:$0x3]  ;;  %v229_v4 = vld [vmem:[%s4424_s9] sm:$0x3]  ;;  %s4446_s21 = scalar_lea.vmem %s5097_s0, %s4150_s10 }
  0x1d   : > { %4140 = vmatprep.subr.msk.bf16.mxu1 %vm383_vm0, %v230_v0  ;;  %4144 = vmatprep.subr.msk.bf16.mxu0 %vm383_vm0, %v4428_v1  ;;  %v385_v2 = vsel %vm383_vm0, %v230_v0, 0  ;;  %v4436_v3 = vsel %vm383_vm0, %v4428_v1, 0  ;;  %v234_v5 = vld [vmem:[%s4424_s9 + $0xa] sm:$0x3]  ;;  %v286_v6 = vld [vmem:[%s4446_s21 + $0x1] sm:$0xff]  ;;  %v3177_v8 = vld [vmem:[%s4446_s21 + $0x19] sm:$0xff] }
  0x1e   : > { %3577 = vmatpush3.bf16.msra.mxu1 %v385_v2  ;;  %3713 = vmatpush3.bf16.msra.mxu0 %v4436_v3  ;;  %v287_v7 = vld [vmem:[%s4446_s21 + $0x9] sm:$0xff]  ;;  %v3178_v10 = vld [vmem:[%s4446_s21 + $0x21] sm:$0xff]  ;;  %v3179_v11 = vld [vmem:[%s4446_s21 + $0x31] sm:$0xff]  ;;  %v597_v14 = vsel %vm383_vm0, %v229_v4, 0  ;;  %v1734_v18 = vsel %vm383_vm0, %v234_v5, 0 }
  0x1f   : > { %4141 = vmatprep.subr.msk.bf16.mxu1 %vm383_vm0, %v229_v4  ;;  %4146 = vmatprep.subr.msk.bf16.mxu0 %vm383_vm0, %v234_v5  ;;  %v318_v9 = vpack.c.bf16 %v287_v7, %v286_v6  ;;  %v3180_v12 = vld [vmem:[%s4446_s21 + $0x39] sm:$0xff]  ;;  %v1377_v13 = vpack.c.bf16 %v3178_v10, %v3177_v8  ;;  %v3181_v16 = vld [vmem:[%s4446_s21 + $0x49] sm:$0xff]  ;;  %v3182_v17 = vld [vmem:[%s4446_s21 + $0x51] sm:$0xff] }
  0x20   : > { %v4455_v15 = vpack.c.bf16 %v3180_v12, %v3179_v11  ;;  %v4461_v19 = vpack.c.bf16 %v3182_v17, %v3181_v16  ;;  %v235_v20 = vld [vmem:[%s4424_s9 + $0xc] sm:$0x3]  ;;  %v4469_v21 = vld [vmem:[%s4424_s9 + $0x4] sm:$0x3]  ;;  %v3185_v24 = vld [vmem:[%s4446_s21 + $0x79] sm:$0xff] }
  0x21   : > { %3578 = vmatprep.mubr.msk.bf16.mxu1 %vm334_vm1, %v318_v9  ;;  %3714 = vmatprep.mubr.msk.bf16.mxu0 %vm334_vm1, %v1377_v13  ;;  %v3183_v22 = vld [vmem:[%s4446_s21 + $0x61] sm:$0xff]  ;;  %v3184_v23 = vld [vmem:[%s4446_s21 + $0x69] sm:$0xff]  ;;  %v3187_v28 = vld [vmem:[%s4446_s21 + $0x91] sm:$0xff]  ;;  %v2027_v52 = vsel %vm383_vm0, %v235_v20, 0 }
  0x22   : > { %3579 = vmatmul.mubr.msk.bf16.vlgmr.msra.gmra.mrb[0].mxu1 %vm334_vm1, %v1377_v13  ;;  %3715 = vmatmul.mubr.msk.bf16.vlgmr.msra.gmra.mrb[0].mxu0 %vm334_vm1, %v4455_v15  ;;  %v3186_v25 = vld [vmem:[%s4446_s21 + $0x81] sm:$0xff]  ;;  %v4482_v26 = vpack.c.bf16 %v3184_v23, %v3183_v22  ;;  %v3188_v29 = vld [vmem:[%s4446_s21 + $0x99] sm:$0xff]  ;;  %v3189_v30 = vld [vmem:[%s4446_s21 + $0xa9] sm:$0xff] }
  0x23   : > { %3611 = vmatpush3.bf16.msra.mxu1 %v597_v14  ;;  %3747 = vmatpush3.bf16.msra.mxu0 %v1734_v18  ;;  %v4484_v27 = vpack.c.bf16 %v3186_v25, %v3185_v24  ;;  %v3190_v31 = vld [vmem:[%s4446_s21 + $0xb1] sm:$0xff]  ;;  %v4498_v32 = vpack.c.bf16 %v3188_v29, %v3187_v28  ;;  %v3191_v34 = vld [vmem:[%s4446_s21 + $0xc1] sm:$0xff]  ;;  %v3192_v35 = vld [vmem:[%s4446_s21 + $0xc9] sm:$0xff] }
  0x24   : > { %3582 = vmatprep.mubr.msk.bf16.mxu1 %vm334_vm1, %v4455_v15  ;;  %3718 = vmatprep.mubr.msk.bf16.mxu0 %vm334_vm1, %v4461_v19  ;;  %v4500_v33 = vpack.c.bf16 %v3190_v31, %v3189_v30  ;;  %v3225_v36 = vld [vmem:[%s4446_s21 + $0x1a] sm:$0xff]  ;;  %v3226_v37 = vld [vmem:[%s4446_s21 + $0x22] sm:$0xff]  ;;  %v4514_v38 = vpack.c.bf16 %v3192_v35, %v3191_v34  ;;  %v3227_v42 = vld [vmem:[%s4446_s21 + $0x32] sm:$0xff] }
  0x25   : > { %4147 = vmatprep.subr.msk.bf16.mxu0 %vm383_vm0, %v235_v20  ;;  %4142 = vmatprep.subr.msk.bf16.mxu1 %vm383_vm0, %v4469_v21  ;;  %v4516_v39 = vpack.c.bf16 %v3226_v37, %v3225_v36  ;;  %v304_v40 = vld [vmem:[%s4446_s21 + $0xd9] sm:$0xff]  ;;  %v305_v41 = vld [vmem:[%s4446_s21 + $0xe1] sm:$0xff]  ;;  %v306_v44 = vld [vmem:[%s4446_s21 + $0xf1] sm:$0xff] }
  0x26   : > { %v3228_v43 = vld [vmem:[%s4446_s21 + $0x3a] sm:$0xff]  ;;  %v3229_v46 = vld [vmem:[%s4446_s21 + $0x4a] sm:$0xff]  ;;  %v3230_v47 = vld [vmem:[%s4446_s21 + $0x52] sm:$0xff]  ;;  %v4534_v48 = vpack.c.bf16 %v305_v41, %v304_v40 }
  0x27   : > { %v307_v45 = vld [vmem:[%s4446_s21 + $0xf9] sm:$0xff]  ;;  %v4536_v49 = vpack.c.bf16 %v3228_v43, %v3227_v42  ;;  %v4540_v51 = vpack.c.bf16 %v3230_v47, %v3229_v46  ;;  %v4546_v53 = vld [vmem:[%s4424_s9 + $0xe] sm:$0x3]  ;;  %v309_v55 = vld [vmem:[%s4446_s21 + $0x111] sm:$0xff]  ;;  %v857_v47 = vsel %vm383_vm0, %v4469_v21, 0 }
  0x28   : > { %v4538_v50 = vpack.c.bf16 %v307_v45, %v306_v44  ;;  %v308_v54 = vld [vmem:[%s4446_s21 + $0x109] sm:$0xff]  ;;  %v310_v58 = vld [vmem:[%s4446_s21 + $0x121] sm:$0xff]  ;;  %v312_v4 = vld [vmem:[%s4446_s21 + $0x139] sm:$0xff] }
  0x29   : > { %v3231_v56 = vld [vmem:[%s4446_s21 + $0x62] sm:$0xff]  ;;  %v3232_v57 = vld [vmem:[%s4446_s21 + $0x6a] sm:$0xff]  ;;  %v3233_v60 = vld [vmem:[%s4446_s21 + $0x7a] sm:$0xff]  ;;  %v4564_v62 = vpack.c.bf16 %v309_v55, %v308_v54 }
  0x2a   : > { %3583 = vmatmul.mubr.msk.bf16.gmra.mrb[4].mxu1 %vm334_vm1, %v4461_v19  ;;  %3719 = vmatmul.mubr.msk.bf16.gmra.mrb[4].mxu0 %vm334_vm1, %v4482_v26  ;;  %v311_v59 = vld [vmem:[%s4446_s21 + $0x129] sm:$0xff]  ;;  %v4566_v63 = vpack.c.bf16 %v3232_v57, %v3231_v56  ;;  %v313_v5 = vld [vmem:[%s4446_s21 + $0x141] sm:$0xff]  ;;  %v3235_v6 = vld [vmem:[%s4446_s21 + $0x92] sm:$0xff] }
  0x2b   : > { %3586 = vmatprep.mubr.msk.bf16.mxu1 %vm334_vm1, %v4482_v26  ;;  %3722 = vmatprep.mubr.msk.bf16.mxu0 %vm334_vm1, %v4484_v27  ;;  %v3234_v61 = vld [vmem:[%s4446_s21 + $0x82] sm:$0xff]  ;;  %v4568_v0 = vpack.c.bf16 %v311_v59, %v310_v58  ;;  %v3236_v7 = vld [vmem:[%s4446_s21 + $0x9a] sm:$0xff]  ;;  %v314_v8 = vld [vmem:[%s4446_s21 + $0x151] sm:$0xff]  ;;  %v4588_v12 = vpack.c.bf16 %v313_v5, %v312_v4 }
  0x2c   : > { %v4570_v2 = vpack.c.bf16 %v3234_v61, %v3233_v60  ;;  %v315_v9 = vld [vmem:[%s4446_s21 + $0x159] sm:$0xff]  ;;  %v3237_v10 = vld [vmem:[%s4446_s21 + $0xaa] sm:$0xff]  ;;  %v4590_v13 = vpack.c.bf16 %v3236_v7, %v3235_v6  ;;  %v3239_v20 = vld [vmem:[%s4446_s21 + $0xc2] sm:$0xff] }
  0x2d   : > { %v3238_v11 = vld [vmem:[%s4446_s21 + $0xb2] sm:$0xff]  ;;  %v4592_v14 = vpack.c.bf16 %v315_v9, %v314_v8  ;;  %v316_v17 = vld [vmem:[%s4446_s21 + $0x169] sm:$0xff]  ;;  %v238_v23 = vld [vmem:[%s4446_s21] sm:$0xff] }
  0x2e   : > { %v4594_v16 = vpack.c.bf16 %v3238_v11, %v3237_v10  ;;  %v317_v18 = vld [vmem:[%s4446_s21 + $0x171] sm:$0xff]  ;;  %v239_v24 = vld [vmem:[%s4446_s21 + $0x8] sm:$0xff]  ;;  %v3241_v25 = vld [vmem:[%s4446_s21 + $0xda] sm:$0xff] }
  0x2f   : > { %v3240_v22 = vld [vmem:[%s4446_s21 + $0xca] sm:$0xff]  ;;  %v3242_v28 = vld [vmem:[%s4446_s21 + $0xe2] sm:$0xff]  ;;  %v4612_v29 = vpack.c.bf16 %v317_v18, %v316_v17  ;;  %v270_v31 = vpack.c.bf16 %v239_v24, %v238_v23  ;;  %v240_v35 = vld [vmem:[%s4446_s21 + $0x18] sm:$0xff] }
  0x30   : > { %v4614_v30 = vpack.c.bf16 %v3240_v22, %v3239_v20  ;;  %v4616_v34 = vpack.c.bf16 %v3242_v28, %v3241_v25  ;;  %v241_v36 = vld [vmem:[%s4446_s21 + $0x20] sm:$0xff]  ;;  %v3243_v37 = vld [vmem:[%s4446_s21 + $0xf2] sm:$0xff]  ;;  %v3245_v43 = vld [vmem:[%s4446_s21 + $0x10a] sm:$0xff] }
  0x31   : > { %v3244_v40 = vld [vmem:[%s4446_s21 + $0xfa] sm:$0xff]  ;;  %v242_v41 = vld [vmem:[%s4446_s21 + $0x30] sm:$0xff]  ;;  %v4633_v45 = vpack.c.bf16 %v241_v36, %v240_v35  ;;  %v4646_v55 = vld [vmem:[%s4424_s9 + $0x6] sm:$0x3] }
  0x32   : > { %3587 = vmatmul.mubr.msk.bf16.gmra.mrb[8].mxu1 %vm334_vm1, %v4484_v27  ;;  %3723 = vmatmul.mubr.msk.bf16.gmra.mrb[8].mxu0 %vm334_vm1, %v4498_v32  ;;  %v243_v42 = vld [vmem:[%s4446_s21 + $0x38] sm:$0xff]  ;;  %v4635_v46 = vpack.c.bf16 %v3244_v40, %v3243_v37  ;;  %v244_v56 = vld [vmem:[%s4446_s21 + $0x48] sm:$0xff]  ;;  %v245_v57 = vld [vmem:[%s4446_s21 + $0x50] sm:$0xff] }
  0x33   : > { %3590 = vmatprep.mubr.msk.bf16.mxu1 %vm334_vm1, %v4498_v32  ;;  %3726 = vmatprep.mubr.msk.bf16.mxu0 %vm334_vm1, %v4500_v33  ;;  %v3246_v44 = vld [vmem:[%s4446_s21 + $0x112] sm:$0xff]  ;;  %v3247_v58 = vld [vmem:[%s4446_s21 + $0x122] sm:$0xff]  ;;  %v3248_v21 = vld [vmem:[%s4446_s21 + $0x12a] sm:$0xff]  ;;  %v4664_v5 = vpack.c.bf16 %v245_v57, %v244_v56 }
  0x34   : > { %v4641_v54 = vpack.c.bf16 %v3246_v44, %v3245_v43  ;;  %v246_v59 = vld [vmem:[%s4446_s21 + $0x60] sm:$0xff]  ;;  %v247_v60 = vld [vmem:[%s4446_s21 + $0x68] sm:$0xff]  ;;  %v4666_v6 = vpack.c.bf16 %v3248_v21, %v3247_v58  ;;  %v248_v9 = vld [vmem:[%s4446_s21 + $0x78] sm:$0xff] }
  0x35   : > { %v3249_v61 = vld [vmem:[%s4446_s21 + $0x13a] sm:$0xff]  ;;  %v3250_v4 = vld [vmem:[%s4446_s21 + $0x142] sm:$0xff]  ;;  %v4668_v7 = vpack.c.bf16 %v247_v60, %v246_v59  ;;  %v3251_v11 = vld [vmem:[%s4446_s21 + $0x152] sm:$0xff] }
  0x36   : > { %v4670_v8 = vpack.c.bf16 %v3250_v4, %v3249_v61  ;;  %v249_v10 = vld [vmem:[%s4446_s21 + $0x80] sm:$0xff]  ;;  %v250_v18 = vld [vmem:[%s4446_s21 + $0x90] sm:$0xff]  ;;  %v251_v20 = vld [vmem:[%s4446_s21 + $0x98] sm:$0xff]  ;;  %v2319_v61 = vsel %vm383_vm0, %v4546_v53, 0 }
  0x37   : > { %v3252_v17 = vld [vmem:[%s4446_s21 + $0x15a] sm:$0xff]  ;;  %v3253_v22 = vld [vmem:[%s4446_s21 + $0x16a] sm:$0xff]  ;;  %v3254_v23 = vld [vmem:[%s4446_s21 + $0x172] sm:$0xff]  ;;  %v4688_v24 = vpack.c.bf16 %v249_v10, %v248_v9  ;;  %v4692_v28 = vpack.c.bf16 %v251_v20, %v250_v18 }
  0x38   : > { %v4690_v25 = vpack.c.bf16 %v3252_v17, %v3251_v11  ;;  %v252_v35 = vld [vmem:[%s4446_s21 + $0xa8] sm:$0xff]  ;;  %v253_v36 = vld [vmem:[%s4446_s21 + $0xb0] sm:$0xff]  ;;  %v256_v56 = vld [vmem:[%s4446_s21 + $0xd8] sm:$0xff] }
  0x39   : > { %v3255_v37 = vld [vmem:[%s4446_s21 + $0x182] sm:$0xff]  ;;  %v3256_v40 = vld [vmem:[%s4446_s21 + $0x18a] sm:$0xff]  ;;  %v4710_v43 = vpack.c.bf16 %v253_v36, %v252_v35  ;;  %v259_v21 = vld [vmem:[%s4446_s21 + $0xf8] sm:$0xff] }
  0x3a   : > { %3591 = vmatmul.mubr.msk.bf16.gmra.mrb[12].mxu1 %vm334_vm1, %v4500_v33  ;;  %3727 = vmatmul.mubr.msk.bf16.gmra.mrb[12].mxu0 %vm334_vm1, %v4514_v38  ;;  %v4712_v44 = vpack.c.bf16 %v3256_v40, %v3255_v37  ;;  %v257_v57 = vld [vmem:[%s4446_s21 + $0xe0] sm:$0xff]  ;;  %v258_v58 = vld [vmem:[%s4446_s21 + $0xf0] sm:$0xff]  ;;  %v260_v9 = vld [vmem:[%s4446_s21 + $0x108] sm:$0xff] }
  0x3b   : > { %3594 = vmatprep.mubr.msk.bf16.mxu1 %vm334_vm1, %v4514_v38  ;;  %3748 = vmatprep.mubr.msk.bf16.mxu0 %vm334_vm1, %v4516_v39  ;;  %v4728_v59 = vpack.c.bf16 %v257_v57, %v256_v56  ;;  %v4730_v60 = vpack.c.bf16 %v259_v21, %v258_v58  ;;  %v237_v4 = vld [vmem:[%s4424_s9 + $0x10] sm:$0x3]  ;;  %v263_v11 = vld [vmem:[%s4446_s21 + $0x128] sm:$0xff]  ;;  %v264_v20 = vld [vmem:[%s4446_s21 + $0x138] sm:$0xff]  ;;  %v1150_v21 = vsel %vm383_vm0, %v4646_v55, 0 }
  0x3c   : > { %v261_v10 = vld [vmem:[%s4446_s21 + $0x110] sm:$0xff]  ;;  %v267_v35 = vld [vmem:[%s4446_s21 + $0x158] sm:$0xff]  ;;  %v268_v40 = vld [vmem:[%s4446_s21 + $0x168] sm:$0xff] }
  0x3d   : > { %v4748_v17 = vpack.c.bf16 %v261_v10, %v260_v9  ;;  %v761_v56 = vld [vmem:[%s4446_s21 + $0xa] sm:$0xff]  ;;  %v3304_v9 = vld [vmem:[%s4446_s21 + $0x1a0] sm:$0xff] }
  0x42   : > { %3595 = vmatmul.mubr.msk.bf16.gmra.mrb[16].mxu1 %vm334_vm1, %v4534_v48  ;;  %3749 = vmatmul.mubr.msk.bf16.vlgmr.msra.gmra.mrb[0].mxu0 %vm334_vm1, %v4536_v49 }
  0x43   : > { %3598 = vmatprep.mubr.msk.bf16.mxu1 %vm334_vm1, %v4538_v50  ;;  %3781 = vmatpush3.bf16.msra.mxu0 %v2027_v52  ;;  %v4639_v52 = vpack.c.bf16 %v243_v42, %v242_v41  ;;  %v254_v41 = vld [vmem:[%s4446_s21 + $0xc0] sm:$0xff]  ;;  %v255_v42 = vld [vmem:[%s4446_s21 + $0xc8] sm:$0xff] }
  0x44   : > { %3752 = vmatprep.mubr.msk.bf16.mxu0 %vm334_vm1, %v4540_v51  ;;  %4148 = vmatprep.subr.msk.bf16.mxu0 %vm383_vm0, %v4546_v53  ;;  %v262_v53 = vld [vmem:[%s4446_s21 + $0x120] sm:$0xff] }
  0x45   : > { %v4750_v18 = vpack.c.bf16 %v263_v11, %v262_v53  ;;  %v2611_v53 = vsel %vm383_vm0, %v237_v4, 0 }
  0x4a   : > { %3599 = vmatmul.mubr.msk.bf16.gmra.mrb[20].mxu1 %vm334_vm1, %v4564_v62  ;;  %3753 = vmatmul.mubr.msk.bf16.gmra.mrb[4].mxu0 %vm334_vm1, %v4566_v63 }
  0x4b   : > { %3602 = vmatprep.mubr.msk.bf16.mxu1 %vm334_vm1, %v4568_v0  ;;  %3756 = vmatprep.mubr.msk.bf16.mxu0 %vm334_vm1, %v4570_v2 }
  0x52   : > { %3603 = vmatmul.mubr.msk.bf16.gmra.mrb[24].mxu1 %vm334_vm1, %v4588_v12  ;;  %3757 = vmatmul.mubr.msk.bf16.gmra.mrb[8].mxu0 %vm334_vm1, %v4590_v13 }
  0x53   : > { %3606 = vmatprep.mubr.msk.bf16.mxu1 %vm334_vm1, %v4592_v14  ;;  %3760 = vmatprep.mubr.msk.bf16.mxu0 %vm334_vm1, %v4594_v16 }
  0x5a   : > { %3607 = vmatmul.mubr.msk.bf16.gmra.mrb[28].mxu1 %vm334_vm1, %v4612_v29  ;;  %3761 = vmatmul.mubr.msk.bf16.gmra.mrb[12].mxu0 %vm334_vm1, %v4614_v30 }
  0x5b   : > { %3612 = vmatprep.mubr.msk.bf16.mxu1 %vm334_vm1, %v270_v31  ;;  %3764 = vmatprep.mubr.msk.bf16.mxu0 %vm334_vm1, %v4616_v34  ;;  %v4694_v31 = vpack.c.bf16 %v3254_v23, %v3253_v22  ;;  %v265_v22 = vld [vmem:[%s4446_s21 + $0x140] sm:$0xff]  ;;  %v266_v23 = vld [vmem:[%s4446_s21 + $0x150] sm:$0xff] }
  0x5c   : > { %v4764_v36 = vpack.c.bf16 %v265_v22, %v264_v20  ;;  %v4766_v37 = vpack.c.bf16 %v267_v35, %v266_v23 }
  0x62   : > { %3613 = vmatmul.mubr.msk.bf16.vlgmr.msra.gmra.mrb[0].mxu1 %vm334_vm1, %v4633_v45  ;;  %3765 = vmatmul.mubr.msk.bf16.gmra.mrb[16].mxu0 %vm334_vm1, %v4635_v46 }
  0x63   : > { %3645 = vmatpush3.bf16.msra.mxu1 %v857_v47  ;;  %3616 = vmatprep.mubr.msk.bf16.mxu1 %vm334_vm1, %v4639_v52  ;;  %v4714_v47 = vpack.c.bf16 %v255_v42, %v254_v41  ;;  %v269_v41 = vld [vmem:[%s4446_s21 + $0x170] sm:$0xff]  ;;  %v760_v42 = vld [vmem:[%s4446_s21 + $0x2] sm:$0xff] }
  0x64   : > { %3768 = vmatprep.mubr.msk.bf16.mxu0 %vm334_vm1, %v4641_v54  ;;  %4143 = vmatprep.subr.msk.bf16.mxu1 %vm383_vm0, %v4646_v55  ;;  %v4780_v57 = vpack.c.bf16 %v269_v41, %v268_v40  ;;  %v792_v58 = vpack.c.bf16 %v761_v56, %v760_v42  ;;  %v3302_v55 = vld [vmem:[%s4446_s21 + $0x188] sm:$0xff] }
  0x6a   : > { %3617 = vmatmul.mubr.msk.bf16.gmra.mrb[4].mxu1 %vm334_vm1, %v4664_v5  ;;  %3769 = vmatmul.mubr.msk.bf16.gmra.mrb[20].mxu0 %vm334_vm1, %v4666_v6 }
  0x6b   : > { %3620 = vmatprep.mubr.msk.bf16.mxu1 %vm334_vm1, %v4668_v7  ;;  %3772 = vmatprep.mubr.msk.bf16.mxu0 %vm334_vm1, %v4670_v8 }
  0x72   : > { %3621 = vmatmul.mubr.msk.bf16.gmra.mrb[8].mxu1 %vm334_vm1, %v4688_v24  ;;  %3773 = vmatmul.mubr.msk.bf16.gmra.mrb[24].mxu0 %vm334_vm1, %v4690_v25 }
  0x73   : > { %3624 = vmatprep.mubr.msk.bf16.mxu1 %vm334_vm1, %v4692_v28  ;;  %3776 = vmatprep.mubr.msk.bf16.mxu0 %vm334_vm1, %v4694_v31 }
  0x7a   : > { %3625 = vmatmul.mubr.msk.bf16.gmra.mrb[12].mxu1 %vm334_vm1, %v4710_v43  ;;  %3777 = vmatmul.mubr.msk.bf16.gmra.mrb[28].mxu0 %vm334_vm1, %v4712_v44 }
  0x7b   : > { %3628 = vmatprep.mubr.msk.bf16.mxu1 %vm334_vm1, %v4714_v47  ;;  %3782 = vmatprep.mubr.msk.bf16.mxu0 %vm334_vm1, %v4639_v52 }
  0x82   : > { %3629 = vmatmul.mubr.msk.bf16.gmra.mrb[16].mxu1 %vm334_vm1, %v4728_v59  ;;  %3783 = vmatmul.mubr.msk.bf16.vlgmr.msra.gmra.mrb[0].mxu0 %vm334_vm1, %v4664_v5 }
  0x83   : > { %3632 = vmatprep.mubr.msk.bf16.mxu1 %vm334_vm1, %v4730_v60  ;;  %3815 = vmatpush3.bf16.msra.mxu0 %v2319_v61 }
  0x84   : > { %3786 = vmatprep.mubr.msk.bf16.mxu0 %vm334_vm1, %v4668_v7  ;;  %4149 = vmatprep.subr.msk.bf16.mxu0 %vm383_vm0, %v237_v4 }
  0x8a   : > { %3633 = vmatmul.mubr.msk.bf16.gmra.mrb[20].mxu1 %vm334_vm1, %v4748_v17  ;;  %3787 = vmatmul.mubr.msk.bf16.gmra.mrb[4].mxu0 %vm334_vm1, %v4688_v24 }
  0x8b   : > { %3636 = vmatprep.mubr.msk.bf16.mxu1 %vm334_vm1, %v4750_v18  ;;  %3790 = vmatprep.mubr.msk.bf16.mxu0 %vm334_vm1, %v4692_v28 }
  0x92   : > { %3637 = vmatmul.mubr.msk.bf16.gmra.mrb[24].mxu1 %vm334_vm1, %v4764_v36  ;;  %3791 = vmatmul.mubr.msk.bf16.gmra.mrb[8].mxu0 %vm334_vm1, %v4710_v43 }
  0x93   : > { %3640 = vmatprep.mubr.msk.bf16.mxu1 %vm334_vm1, %v4766_v37  ;;  %3794 = vmatprep.mubr.msk.bf16.mxu0 %vm334_vm1, %v4714_v47 }
  0x9a   : > { %3641 = vmatmul.mubr.msk.bf16.gmra.mrb[28].mxu1 %vm334_vm1, %v4780_v57  ;;  %3795 = vmatmul.mubr.msk.bf16.gmra.mrb[12].mxu0 %vm334_vm1, %v4728_v59 }
  0x9b   : > { %3646 = vmatprep.mubr.msk.bf16.mxu1 %vm334_vm1, %v792_v58  ;;  %3798 = vmatprep.mubr.msk.bf16.mxu0 %vm334_vm1, %v4730_v60 }
  0xa2   : > { %3647 = vmatmul.mubr.msk.bf16.vlgmr.msra.gmra.mrb[0].mxu1 %vm334_vm1, %v4516_v39  ;;  %3799 = vmatmul.mubr.msk.bf16.gmra.mrb[16].mxu0 %vm334_vm1, %v4748_v17  ;;  %v3301_v39 = vld [vmem:[%s4446_s21 + $0x180] sm:$0xff] }
  0xa3   : > { %3679 = vmatpush3.bf16.msra.mxu1 %v1150_v21  ;;  %3650 = vmatprep.mubr.msk.bf16.mxu1 %vm334_vm1, %v4536_v49  ;;  %v4811_v61 = vpack.c.bf16 %v3302_v55, %v3301_v39 }
  0xa4   : > { %3802 = vmatprep.mubr.msk.bf16.mxu0 %vm334_vm1, %v4750_v18  ;;  %4145 = vmatprep.subr.msk.bf16.mxu1 %vm383_vm0, %v4428_v1  ;;  %v3303_v1 = vld [vmem:[%s4446_s21 + $0x198] sm:$0xff] }
  0xa5   : > { %v1977_v10 = vpack.c.bf16 %v3304_v9, %v3303_v1 }
  0xaa   : > { %3651 = vmatmul.mubr.msk.bf16.gmra.mrb[4].mxu1 %vm334_vm1, %v4540_v51  ;;  %3803 = vmatmul.mubr.msk.bf16.gmra.mrb[20].mxu0 %vm334_vm1, %v4764_v36 }
  0xab   : > { %3654 = vmatprep.mubr.msk.bf16.mxu1 %vm334_vm1, %v4566_v63  ;;  %3806 = vmatprep.mubr.msk.bf16.mxu0 %vm334_vm1, %v4766_v37 }
  0xb2   : > { %3655 = vmatmul.mubr.msk.bf16.gmra.mrb[8].mxu1 %vm334_vm1, %v4570_v2  ;;  %3807 = vmatmul.mubr.msk.bf16.gmra.mrb[24].mxu0 %vm334_vm1, %v4780_v57 }
  0xb3   : > { %3658 = vmatprep.mubr.msk.bf16.mxu1 %vm334_vm1, %v4590_v13  ;;  %3810 = vmatprep.mubr.msk.bf16.mxu0 %vm334_vm1, %v4811_v61 }
  0xba   : > { %3659 = vmatmul.mubr.msk.bf16.gmra.mrb[12].mxu1 %vm334_vm1, %v4594_v16  ;;  %3811 = vmatmul.mubr.msk.bf16.gmra.mrb[28].mxu0 %vm334_vm1, %v1977_v10 }
  0xbb   : > { %3662 = vmatprep.mubr.msk.bf16.mxu1 %vm334_vm1, %v4614_v30  ;;  %3816 = vmatprep.mubr.msk.bf16.mxu0 %vm334_vm1, %v4455_v15  ;;  %v3350_v15 = vld [vmem:[%s4446_s21 + $0x189] sm:$0xff] }
  0xc2   : > { %3663 = vmatmul.mubr.msk.bf16.gmra.mrb[16].mxu1 %vm334_vm1, %v4616_v34  ;;  %3817 = vmatmul.mubr.msk.bf16.vlgmr.msra.gmra.mrb[0].mxu0 %vm334_vm1, %v4461_v19 }
  0xc3   : > { %3666 = vmatprep.mubr.msk.bf16.mxu1 %vm334_vm1, %v4635_v46  ;;  %3849 = vmatpush3.bf16.msra.mxu0 %v2611_v53 }
  0xc4   : > { %3820 = vmatprep.mubr.msk.bf16.mxu0 %vm334_vm1, %v4482_v26  ;;  %v3351_v26 = vld [vmem:[%s4446_s21 + $0x199] sm:$0xff] }
  0xca   : > { %3667 = vmatmul.mubr.msk.bf16.gmra.mrb[20].mxu1 %vm334_vm1, %v4641_v54  ;;  %3821 = vmatmul.mubr.msk.bf16.gmra.mrb[4].mxu0 %vm334_vm1, %v4484_v27  ;;  %v3352_v27 = vld [vmem:[%s4446_s21 + $0x1a1] sm:$0xff] }
  0xcb   : > { %3670 = vmatprep.mubr.msk.bf16.mxu1 %vm334_vm1, %v4666_v6  ;;  %3824 = vmatprep.mubr.msk.bf16.mxu0 %vm334_vm1, %v4498_v32  ;;  %v2269_v32 = vpack.c.bf16 %v3352_v27, %v3351_v26 }
  0xd2   : > { %3671 = vmatmul.mubr.msk.bf16.gmra.mrb[24].mxu1 %vm334_vm1, %v4670_v8  ;;  %3825 = vmatmul.mubr.msk.bf16.gmra.mrb[8].mxu0 %vm334_vm1, %v4500_v33  ;;  %v3399_v33 = vld [vmem:[%s4446_s21 + $0x19a] sm:$0xff] }
  0xd3   : > { %3674 = vmatprep.mubr.msk.bf16.mxu1 %vm334_vm1, %v4690_v25  ;;  %3828 = vmatprep.mubr.msk.bf16.mxu0 %vm334_vm1, %v4514_v38  ;;  %v3400_v38 = vld [vmem:[%s4446_s21 + $0x1a2] sm:$0xff] }
  0xda   : > { %3675 = vmatmul.mubr.msk.bf16.gmra.mrb[28].mxu1 %vm334_vm1, %v4694_v31  ;;  %3829 = vmatmul.mubr.msk.bf16.gmra.mrb[12].mxu0 %vm334_vm1, %v4534_v48 }
  0xdb   : > { %3680 = vmatprep.mubr.msk.bf16.mxu1 %vm334_vm1, %v4633_v45  ;;  %3832 = vmatprep.mubr.msk.bf16.mxu0 %vm334_vm1, %v4538_v50 }
  0xe2   : > { %3681 = vmatmul.mubr.msk.bf16.vlgmr.msra.gmra.mrb[0].mxu1 %vm334_vm1, %v4639_v52  ;;  %3833 = vmatmul.mubr.msk.bf16.gmra.mrb[16].mxu0 %vm334_vm1, %v4564_v62  ;;  %v4970_v52 = vld [vmem:[%s227_s30] ss:$0 sm:$0xff] }
  0xe3   : > { %3883 = vmatpush3.bf16.msra.mxu1 %v4436_v3  ;;  %3684 = vmatprep.mubr.msk.bf16.mxu1 %vm334_vm1, %v4664_v5  ;;  %v3349_v3 = vld [vmem:[%s4446_s21 + $0x181] sm:$0xff] }
  0xe4   : > { %3836 = vmatprep.mubr.msk.bf16.mxu0 %vm334_vm1, %v4568_v0  ;;  %v2268_v19 = vpack.c.bf16 %v3350_v15, %v3349_v3 }
  0xea   : > { %3685 = vmatmul.mubr.msk.bf16.gmra.mrb[4].mxu1 %vm334_vm1, %v4668_v7  ;;  %3837 = vmatmul.mubr.msk.bf16.gmra.mrb[20].mxu0 %vm334_vm1, %v4588_v12 }
  0xeb   : > { %3688 = vmatprep.mubr.msk.bf16.mxu1 %vm334_vm1, %v4688_v24  ;;  %3840 = vmatprep.mubr.msk.bf16.mxu0 %vm334_vm1, %v4592_v14 }
  0xf2   : > { %3689 = vmatmul.mubr.msk.bf16.gmra.mrb[8].mxu1 %vm334_vm1, %v4692_v28  ;;  %3841 = vmatmul.mubr.msk.bf16.gmra.mrb[24].mxu0 %vm334_vm1, %v4612_v29 }
  0xf3   : > { %3692 = vmatprep.mubr.msk.bf16.mxu1 %vm334_vm1, %v4710_v43  ;;  %3844 = vmatprep.mubr.msk.bf16.mxu0 %vm334_vm1, %v2268_v19 }
  0xfa   : > { %3693 = vmatmul.mubr.msk.bf16.gmra.mrb[12].mxu1 %vm334_vm1, %v4714_v47  ;;  %3845 = vmatmul.mubr.msk.bf16.gmra.mrb[28].mxu0 %vm334_vm1, %v2269_v32 }
  0xfb   : > { %3696 = vmatprep.mubr.msk.bf16.mxu1 %vm334_vm1, %v4728_v59  ;;  %3850 = vmatprep.mubr.msk.bf16.mxu0 %vm334_vm1, %v4536_v49 }
 0x102   : > { %3697 = vmatmul.mubr.msk.bf16.gmra.mrb[16].mxu1 %vm334_vm1, %v4730_v60  ;;  %3851 = vmatmul.mubr.msk.bf16.vlgmr.msra.gmra.mrb[0].mxu0 %vm334_vm1, %v4540_v51 }
 0x103   : > { %3700 = vmatprep.mubr.msk.bf16.mxu1 %vm334_vm1, %v4748_v17  ;;  %3854 = vmatprep.mubr.msk.bf16.mxu0 %vm334_vm1, %v4566_v63 }
 0x10a   : > { %3701 = vmatmul.mubr.msk.bf16.gmra.mrb[20].mxu1 %vm334_vm1, %v4750_v18  ;;  %3855 = vmatmul.mubr.msk.bf16.gmra.mrb[4].mxu0 %vm334_vm1, %v4570_v2 }
 0x10b   : > { %3704 = vmatprep.mubr.msk.bf16.mxu1 %vm334_vm1, %v4764_v36  ;;  %3858 = vmatprep.mubr.msk.bf16.mxu0 %vm334_vm1, %v4590_v13 }
 0x112   : > { %3705 = vmatmul.mubr.msk.bf16.gmra.mrb[24].mxu1 %vm334_vm1, %v4766_v37  ;;  %3859 = vmatmul.mubr.msk.bf16.gmra.mrb[8].mxu0 %vm334_vm1, %v4594_v16 }
 0x113   : > { %3708 = vmatprep.mubr.msk.bf16.mxu1 %vm334_vm1, %v4780_v57  ;;  %3862 = vmatprep.mubr.msk.bf16.mxu0 %vm334_vm1, %v4614_v30 }
 0x11a   : > { %3709 = vmatmul.mubr.msk.bf16.gmra.mrb[28].mxu1 %vm334_vm1, %v4811_v61  ;;  %3863 = vmatmul.mubr.msk.bf16.gmra.mrb[12].mxu0 %vm334_vm1, %v4616_v34 }
 0x11b   : > { %3730 = vmatprep.mubr.msk.bf16.mxu1 %vm334_vm1, %v4534_v48  ;;  %3866 = vmatprep.mubr.msk.bf16.mxu0 %vm334_vm1, %v4635_v46  ;;  %v2561_v48 = vpack.c.bf16 %v3400_v38, %v3399_v33 }
 0x122   : > { %3731 = vmatmul.mubr.msk.bf16.vlgmr.msra.gmra.mrb[16].mxu1 %vm334_vm1, %v4538_v50  ;;  %3867 = vmatmul.mubr.msk.bf16.gmra.mrb[16].mxu0 %vm334_vm1, %v4641_v54 }
 0x123   : > { %3734 = vmatprep.mubr.msk.bf16.mxu1 %vm334_vm1, %v4564_v62  ;;  %3870 = vmatprep.mubr.msk.bf16.mxu0 %vm334_vm1, %v4666_v6 }
 0x12a   : > { %3735 = vmatmul.mubr.msk.bf16.gmra.mrb[20].mxu1 %vm334_vm1, %v4568_v0  ;;  %3871 = vmatmul.mubr.msk.bf16.gmra.mrb[20].mxu0 %vm334_vm1, %v4670_v8 }
 0x12b   : > { %3738 = vmatprep.mubr.msk.bf16.mxu1 %vm334_vm1, %v4588_v12  ;;  %3874 = vmatprep.mubr.msk.bf16.mxu0 %vm334_vm1, %v4690_v25 }
 0x132   : > { %3739 = vmatmul.mubr.msk.bf16.gmra.mrb[24].mxu1 %vm334_vm1, %v4592_v14  ;;  %3875 = vmatmul.mubr.msk.bf16.gmra.mrb[24].mxu0 %vm334_vm1, %v4694_v31 }
 0x133   : > { %3742 = vmatprep.mubr.msk.bf16.mxu1 %vm334_vm1, %v4612_v29  ;;  %3878 = vmatprep.mubr.msk.bf16.mxu0 %vm334_vm1, %v4712_v44 }
 0x13a   : > { %3743 = vmatmul.mubr.msk.bf16.gmra.mrb[28].mxu1 %vm334_vm1, %v2268_v19  ;;  %3879 = vmatmul.mubr.msk.bf16.gmra.mrb[28].mxu0 %vm334_vm1, %v2561_v48 }
 0x1b5   : > { %v3682_v49 = vpop.f32.mrb[0].mxu1 }
 0x1b6   : > { %v1186_v50 = vpop.f32.mrb[1].mxu1 }
 0x1b7   : > { %v3683_v51 = vpop.f32.mrb[2].mxu1 }
 0x1b8   : > { %v1189_v62 = vpop.f32.mrb[3].mxu1 }
 0x1bd   : > { %v3686_v63 = vpop.f32.mrb[4].mxu1 }
 0x1be   : > { %v1202_v0 = vpop.f32.mrb[5].mxu1 }
 0x1bf   : > { %v3687_v2 = vpop.f32.mrb[6].mxu1 }
 0x1c0   : > { %v1205_v12 = vpop.f32.mrb[7].mxu1 }
 0x1c5   : > { %v3690_v13 = vpop.f32.mrb[8].mxu1 }
 0x1c6   : > { %v1218_v14 = vpop.f32.mrb[9].mxu1 }
 0x1c7   : > { %v3691_v16 = vpop.f32.mrb[10].mxu1 }
 0x1c8   : > { %v1221_v29 = vpop.f32.mrb[11].mxu1 }
 0x1cd   : > { %v4958_v30 = vpop.f32.mrb[12].mxu1 }
 0x1ce   : > { %v4960_v34 = vpop.f32.mrb[13].mxu1 }
 0x1cf   : > { %v4962_v45 = vpop.f32.mrb[14].mxu1 }
 0x1d0   : > { %v4964_v46 = vpop.f32.mrb[15].mxu1 }
 0x1d5   : > { %v3852_v54 = vpop.f32.mrb[0].mxu0 }
 0x1d6   : > { %v3884_v5 = vadd.f32 %v3852_v54, %v3682_v49  ;;  %v2647_v6 = vpop.f32.mrb[1].mxu0 }
 0x1d7   : > { %v3885_v7 = vadd.f32 %v2647_v6, %v1186_v50  ;;  %v3853_v8 = vpop.f32.mrb[2].mxu0 }
 0x1d8   : > { %v2815_v24 = vadd.f32 %v3884_v5, %v4970_v52  ;;  %v3886_v25 = vadd.f32 %v3853_v8, %v3683_v51  ;;  %v2650_v28 = vpop.f32.mrb[3].mxu0 }
 0x1d9   : > { %v2813_v31 = vadd.f32 %v3885_v7, %v4970_v52  ;;  %v3887_v43 = vadd.f32 %v2650_v28, %v1189_v62 }
 0x1da   : > { %v2816_v44 = vadd.f32 %v3886_v25, %v4970_v52  ;;  %v2847_v60 = vmax.f32 %v2815_v24, 0.0 }
 0x1db   : > { %v2845_v47 = vmax.f32 %v2813_v31, 0.0  ;;  %v2814_v59 = vadd.f32 %v3887_v43, %v4970_v52 }
 0x1dc   : > { %v2848_v22 = vmax.f32 %v2816_v44, 0.0  ;;  %v2881_v56 = vsel %vm2877_vm2, %v2847_v60, 0.0 }
 0x1dd   : > { %v2846_v4 = vmax.f32 %v2814_v59, 0.0  ;;  %v3856_v11 = vpop.f32.mrb[4].mxu0  ;;  %v2878_v20 = vsel %vm2877_vm2, %v2845_v47, 0.0 }
 0x1de   : > { %v3888_v17 = vadd.f32 %v3856_v11, %v3686_v63  ;;  %v2663_v18 = vpop.f32.mrb[5].mxu0  ;;  %v2883_v55 = vsel %vm2877_vm2, %v2848_v22, 0.0 }
 0x1df   : > { %v2879_v23 = vsel %vm2877_vm2, %v2846_v4, 0.0  ;;  %v3889_v35 = vadd.f32 %v2663_v18, %v1202_v0  ;;  %v3857_v36 = vpop.f32.mrb[6].mxu0 }
 0x1e0   : > { %v2880_v37 = vadd.f32 %v2879_v23, %v2878_v20  ;;  %v2819_v40 = vadd.f32 %v3888_v17, %v4970_v52  ;;  %v3890_v41 = vadd.f32 %v3857_v36, %v3687_v2  ;;  %v2666_v42 = vpop.f32.mrb[7].mxu0 }
 0x1e1   : > { %v2817_v57 = vadd.f32 %v3889_v35, %v4970_v52  ;;  %v3891_v58 = vadd.f32 %v2666_v42, %v1205_v12 }
 0x1e2   : > { %v2882_v21 = vadd.f32 %v2881_v56, %v2880_v37  ;;  %v2820_v39 = vadd.f32 %v3890_v41, %v4970_v52  ;;  %v2851_v10 = vmax.f32 %v2819_v40, 0.0 }
 0x1e3   : > { %v2849_v61 = vmax.f32 %v2817_v57, 0.0  ;;  %v2818_v1 = vadd.f32 %v3891_v58, %v4970_v52 }
 0x1e4   : > { %v2884_v9 = vadd.f32 %v2883_v55, %v2882_v21  ;;  %v2852_v32 = vmax.f32 %v2820_v39, 0.0  ;;  %v2889_v63 = vsel %vm2877_vm2, %v2851_v10, 0.0 }
 0x1e5   : > { %v2885_v53 = vsel %vm2877_vm2, %v2849_v61, 0.0  ;;  %v2850_v3 = vmax.f32 %v2818_v1, 0.0  ;;  %v3860_v15 = vpop.f32.mrb[8].mxu0 }
 0x1e6   : > { %v2886_v19 = vadd.f32 %v2885_v53, %v2884_v9  ;;  %v3892_v26 = vadd.f32 %v3860_v15, %v3690_v13  ;;  %v2679_v27 = vpop.f32.mrb[9].mxu0  ;;  %v2891_v13 = vsel %vm2877_vm2, %v2852_v32, 0.0 }
 0x1e7   : > { %v2887_v33 = vsel %vm2877_vm2, %v2850_v3, 0.0  ;;  %v3893_v38 = vadd.f32 %v2679_v27, %v1218_v14  ;;  %v3861_v48 = vpop.f32.mrb[10].mxu0 }
 0x1e8   : > { %v2888_v49 = vadd.f32 %v2887_v33, %v2886_v19  ;;  %v2823_v50 = vadd.f32 %v3892_v26, %v4970_v52  ;;  %v3894_v51 = vadd.f32 %v3861_v48, %v3691_v16  ;;  %v2682_v62 = vpop.f32.mrb[11].mxu0 }
 0x1e9   : > { %v2821_v0 = vadd.f32 %v3893_v38, %v4970_v52  ;;  %v3895_v2 = vadd.f32 %v2682_v62, %v1221_v29 }
 0x1ea   : > { %v2890_v12 = vadd.f32 %v2889_v63, %v2888_v49  ;;  %v2824_v54 = vadd.f32 %v3894_v51, %v4970_v52  ;;  %v2855_v7 = vmax.f32 %v2823_v50, 0.0 }
 0x1eb   : > { %v2853_v5 = vmax.f32 %v2821_v0, 0.0  ;;  %v2822_v6 = vadd.f32 %v3895_v2, %v4970_v52 }
 0x1ec   : > { %v2892_v14 = vadd.f32 %v2891_v13, %v2890_v12  ;;  %v2856_v43 = vmax.f32 %v2824_v54, 0.0  ;;  %v2897_v17 = vsel %vm2877_vm2, %v2855_v7, 0.0 }
 0x1ed   : > { %v2893_v8 = vsel %vm2877_vm2, %v2853_v5, 0.0  ;;  %v2854_v24 = vmax.f32 %v2822_v6, 0.0  ;;  %v3864_v16 = vpop.f32.mrb[12].mxu0 }
 0x1ee   : > { %v2894_v25 = vadd.f32 %v2893_v8, %v2892_v14  ;;  %v3896_v28 = vadd.f32 %v3864_v16, %v4958_v30  ;;  %v2695_v31 = vpop.f32.mrb[13].mxu0  ;;  %v2899_v23 = vsel %vm2877_vm2, %v2856_v43, 0.0 }
 0x1ef   : > { %v2895_v29 = vsel %vm2877_vm2, %v2854_v24, 0.0  ;;  %v3897_v44 = vadd.f32 %v2695_v31, %v4960_v34  ;;  %v3865_v47 = vpop.f32.mrb[14].mxu0 }
 0x1f0   : > { %v2896_v59 = vadd.f32 %v2895_v29, %v2894_v25  ;;  %v2827_v60 = vadd.f32 %v3896_v28, %v4970_v52  ;;  %v3898_v4 = vadd.f32 %v3865_v47, %v4962_v45  ;;  %v2698_v11 = vpop.f32.mrb[15].mxu0 }
 0x1f1   : > { %v2825_v18 = vadd.f32 %v3897_v44, %v4970_v52  ;;  %v3899_v20 = vadd.f32 %v2698_v11, %v4964_v46 }
 0x1f2   : > { %v2898_v30 = vadd.f32 %v2897_v17, %v2896_v59  ;;  %v2828_v22 = vadd.f32 %v3898_v4, %v4970_v52  ;;  %v2859_v40 = vmax.f32 %v2827_v60, 0.0 }
 0x1f3   : > { %v2857_v35 = vmax.f32 %v2825_v18, 0.0  ;;  %v2826_v34 = vadd.f32 %v3899_v20, %v4970_v52 }
 0x1f4   : > { %v2900_v36 = vadd.f32 %v2899_v23, %v2898_v30  ;;  %v2860_v39 = vmax.f32 %v2828_v22, 0.0  ;;  %v2905_v19 = vsel %vm2877_vm2, %v2859_v40, 0.0 }
 0x1f5   : > { %v3732_v37 = vpop.f32.mrb[16].mxu1  ;;  %v2901_v45 = vsel %vm2877_vm2, %v2857_v35, 0.0  ;;  %v2858_v41 = vmax.f32 %v2826_v34, 0.0  ;;  %v3868_v42 = vpop.f32.mrb[16].mxu0 }
 0x1f6   : > { %v1542_v56 = vpop.f32.mrb[17].mxu1  ;;  %v2902_v57 = vadd.f32 %v2901_v45, %v2900_v36  ;;  %v3900_v58 = vadd.f32 %v3868_v42, %v3732_v37  ;;  %v2711_v21 = vpop.f32.mrb[17].mxu0  ;;  %v2907_v38 = vsel %vm2877_vm2, %v2860_v39, 0.0 }
 0x1f7   : > { %v3733_v46 = vpop.f32.mrb[18].mxu1  ;;  %v2903_v55 = vsel %vm2877_vm2, %v2858_v41, 0.0  ;;  %v3901_v61 = vadd.f32 %v2711_v21, %v1542_v56  ;;  %v3869_v1 = vpop.f32.mrb[18].mxu0 }
 0x1f8   : > { %v1545_v9 = vpop.f32.mrb[19].mxu1  ;;  %v2904_v10 = vadd.f32 %v2903_v55, %v2902_v57  ;;  %v2831_v53 = vadd.f32 %v3900_v58, %v4970_v52  ;;  %v3902_v3 = vadd.f32 %v3869_v1, %v3733_v46  ;;  %v2714_v15 = vpop.f32.mrb[19].mxu0 }
 0x1f9   : > { %v2829_v26 = vadd.f32 %v3901_v61, %v4970_v52  ;;  %v3903_v27 = vadd.f32 %v2714_v15, %v1545_v9 }
 0x1fa   : > { %v2906_v32 = vadd.f32 %v2905_v19, %v2904_v10  ;;  %v2832_v33 = vadd.f32 %v3902_v3, %v4970_v52  ;;  %v2863_v62 = vmax.f32 %v2831_v53, 0.0 }
 0x1fb   : > { %v2861_v48 = vmax.f32 %v2829_v26, 0.0  ;;  %v2830_v49 = vadd.f32 %v3903_v27, %v4970_v52 }
 0x1fc   : > { %v2908_v50 = vadd.f32 %v2907_v38, %v2906_v32  ;;  %v2864_v14 = vmax.f32 %v2832_v33, 0.0  ;;  %v2913_v29 = vsel %vm2877_vm2, %v2863_v62, 0.0 }
 0x1fd   : > { %v3736_v51 = vpop.f32.mrb[20].mxu1  ;;  %v2909_v63 = vsel %vm2877_vm2, %v2861_v48, 0.0  ;;  %v2862_v0 = vmax.f32 %v2830_v49, 0.0  ;;  %v3872_v2 = vpop.f32.mrb[20].mxu0 }
 0x1fe   : > { %v1558_v12 = vpop.f32.mrb[21].mxu1  ;;  %v2910_v54 = vadd.f32 %v2909_v63, %v2908_v50  ;;  %v3904_v13 = vadd.f32 %v3872_v2, %v3736_v51  ;;  %v2727_v5 = vpop.f32.mrb[21].mxu0  ;;  %v2915_v4 = vsel %vm2877_vm2, %v2864_v14, 0.0 }
 0x1ff   : > { %v3737_v6 = vpop.f32.mrb[22].mxu1  ;;  %v2911_v7 = vsel %vm2877_vm2, %v2862_v0, 0.0  ;;  %v3905_v8 = vadd.f32 %v2727_v5, %v1558_v12  ;;  %v3873_v24 = vpop.f32.mrb[22].mxu0 }
 0x200   : > { %v1561_v16 = vpop.f32.mrb[23].mxu1  ;;  %v2912_v25 = vadd.f32 %v2911_v7, %v2910_v54  ;;  %v2835_v28 = vadd.f32 %v3904_v13, %v4970_v52  ;;  %v3906_v31 = vadd.f32 %v3873_v24, %v3737_v6  ;;  %v2730_v43 = vpop.f32.mrb[23].mxu0 }
 0x201   : > { %v2833_v44 = vadd.f32 %v3905_v8, %v4970_v52  ;;  %v3907_v47 = vadd.f32 %v2730_v43, %v1561_v16 }
 0x202   : > { %v2914_v59 = vadd.f32 %v2913_v29, %v2912_v25  ;;  %v2836_v60 = vadd.f32 %v3906_v31, %v4970_v52  ;;  %v2867_v30 = vmax.f32 %v2835_v28, 0.0 }
 0x203   : > { %v2865_v11 = vmax.f32 %v2833_v44, 0.0  ;;  %v2834_v17 = vadd.f32 %v3907_v47, %v4970_v52 }
 0x204   : > { %v2916_v18 = vadd.f32 %v2915_v4, %v2914_v59  ;;  %v2868_v41 = vmax.f32 %v2836_v60, 0.0  ;;  %v2921_v61 = vsel %vm2877_vm2, %v2867_v30, 0.0 }
 0x205   : > { %v3740_v20 = vpop.f32.mrb[24].mxu1  ;;  %v2917_v22 = vsel %vm2877_vm2, %v2865_v11, 0.0  ;;  %v2866_v23 = vmax.f32 %v2834_v17, 0.0  ;;  %v3876_v35 = vpop.f32.mrb[24].mxu0 }
 0x206   : > { %v1574_v34 = vpop.f32.mrb[25].mxu1  ;;  %v2918_v36 = vadd.f32 %v2917_v22, %v2916_v18  ;;  %v3908_v37 = vadd.f32 %v3876_v35, %v3740_v20  ;;  %v2743_v40 = vpop.f32.mrb[25].mxu0  ;;  %v2923_v3 = vsel %vm2877_vm2, %v2868_v41, 0.0  ;;  %v4322_v41 = vmov (!%p3418_p0), 0.0  }
 0x207   : > { %v3741_v45 = vpop.f32.mrb[26].mxu1  ;;  %v2919_v42 = vsel %vm2877_vm2, %v2866_v23, 0.0  ;;  %v3909_v56 = vadd.f32 %v2743_v40, %v1574_v34  ;;  %v3877_v57 = vpop.f32.mrb[26].mxu0  ;;  %2953 = vst.msk [vmem:[%s210_s4] sm:$0x1] (!%p3418_p0), %vm2952_vm3, %v4322_v41 }
 0x208   : > { %v1577_v58 = vpop.f32.mrb[27].mxu1  ;;  %v2920_v21 = vadd.f32 %v2919_v42, %v2918_v36  ;;  %v2839_v46 = vadd.f32 %v3908_v37, %v4970_v52  ;;  %v3910_v39 = vadd.f32 %v3877_v57, %v3741_v45  ;;  %v2746_v55 = vpop.f32.mrb[27].mxu0 }
 0x209   : > { %v2837_v1 = vadd.f32 %v3909_v56, %v4970_v52  ;;  %v3911_v9 = vadd.f32 %v2746_v55, %v1577_v58 }
 0x20a   : > { %v2922_v10 = vadd.f32 %v2921_v61, %v2920_v21  ;;  %v2840_v53 = vadd.f32 %v3910_v39, %v4970_v52  ;;  %v2871_v32 = vmax.f32 %v2839_v46, 0.0 }
 0x20b   : > { %v2869_v15 = vmax.f32 %v2837_v1, 0.0  ;;  %v2838_v19 = vadd.f32 %v3911_v9, %v4970_v52 }
 0x20c   : > { %v2924_v26 = vadd.f32 %v2923_v3, %v2922_v10  ;;  %v2872_v0 = vmax.f32 %v2840_v53, 0.0  ;;  %v2929_v8 = vsel %vm2877_vm2, %v2871_v32, 0.0 }
 0x20d   : > { %v3744_v27 = vpop.f32.mrb[28].mxu1  ;;  %v2925_v33 = vsel %vm2877_vm2, %v2869_v15, 0.0  ;;  %v2870_v38 = vmax.f32 %v2838_v19, 0.0  ;;  %v3880_v48 = vpop.f32.mrb[28].mxu0 }
 0x20e   : > { %v1590_v49 = vpop.f32.mrb[29].mxu1  ;;  %v2926_v50 = vadd.f32 %v2925_v33, %v2924_v26  ;;  %v3912_v51 = vadd.f32 %v3880_v48, %v3744_v27  ;;  %v2759_v62 = vpop.f32.mrb[29].mxu0  ;;  %v2931_v31 = vsel %vm2877_vm2, %v2872_v0, 0.0 }
 0x20f   : > { %v3745_v63 = vpop.f32.mrb[30].mxu1  ;;  %v2927_v2 = vsel %vm2877_vm2, %v2870_v38, 0.0  ;;  %v3913_v12 = vadd.f32 %v2759_v62, %v1590_v49  ;;  %v3881_v54 = vpop.f32.mrb[30].mxu0 }
 0x210   : > { %v1593_v13 = vpop.f32.mrb[31].mxu1  ;;  %v2928_v5 = vadd.f32 %v2927_v2, %v2926_v50  ;;  %v2843_v6 = vadd.f32 %v3912_v51, %v4970_v52  ;;  %v3914_v14 = vadd.f32 %v3881_v54, %v3745_v63  ;;  %v2762_v7 = vpop.f32.mrb[31].mxu0 }
 0x211   : > { %v2841_v24 = vadd.f32 %v3913_v12, %v4970_v52  ;;  %v3915_v16 = vadd.f32 %v2762_v7, %v1593_v13 }
 0x212   : > { %v2930_v25 = vadd.f32 %v2929_v8, %v2928_v5  ;;  %v2844_v28 = vadd.f32 %v3914_v14, %v4970_v52  ;;  %v2875_v47 = vmax.f32 %v2843_v6, 0.0 }
 0x213   : > { %v2873_v43 = vmax.f32 %v2841_v24, 0.0  ;;  %v2842_v29 = vadd.f32 %v3915_v16, %v4970_v52 }
 0x214   : > { %v2932_v44 = vadd.f32 %v2931_v31, %v2930_v25  ;;  %v2876_v11 = vmax.f32 %v2844_v28, 0.0  ;;  %v2937_v20 = vsel %vm2877_vm2, %v2875_v47, 0.0 }
 0x215   : > { %v2933_v59 = vsel %vm2877_vm2, %v2873_v43, 0.0  ;;  %v2874_v60 = vmax.f32 %v2842_v29, 0.0 }
 0x216   : > { %v2934_v4 = vadd.f32 %v2933_v59, %v2932_v44  ;;  %v2939_v22 = vsel %vm2877_vm2, %v2876_v11, 0.0 }
 0x217   : > { %v2935_v17 = vsel %vm2877_vm2, %v2874_v60, 0.0 }
 0x218   : > { %v2936_v18 = vadd.f32 %v2935_v17, %v2934_v4 }
 0x21a   : > { %v2938_v30 = vadd.f32 %v2937_v20, %v2936_v18 }
 0x21c   : > { %v2940_v23 = vadd.f32 %v2939_v22, %v2938_v30 }
 0x21e   : > { %v2941_v35 = vrot.slane %v2940_v23, 4 }
 0x220   : > { %v2942_v34 = vadd.f32 %v2941_v35, %v2940_v23 }
 0x222   : > { %v2943_v52 = vrot.slane %v2942_v34, 2 }
 0x224   : > { %v2944_v36 = vadd.f32 %v2943_v52, %v2942_v34  ;;  %2951 = sbr.rel (%p3418_p0) target bundleno = 555 (0x22b), region = 36 }
 0x226   : > { %v2945_v37 = vrot.slane %v2944_v36, 1 }
 0x228   : > { %v2946_v40 = vadd.f32 %v2945_v37, %v2944_v36 }
 0x22a   : > { %v2947_v45 = vmul.f32 0.00390625, %v2946_v40 }
 0x22b PF: > { %v2954_v42 = vld [vmem:[%s210_s4] sm:$0x1]  ;;  %vm2956_vm4 = vcmask 253952   ;;  %p3419_p1 = scmp.ne.s32.totalorder %s4304_s15, 1 }
 0x22c   : > { %v2955_v56 = vadd.f32 %v2954_v42, %v2947_v45 }
 0x22d   : > { %2961 = sbr.rel (%p3419_p1) target bundleno = 727 (0x2d7), region = 40 }
 0x22e   : > { %2957 = vst.msk [vmem:[%s210_s4] sm:$0x1] %vm2956_vm4, %v2955_v56 }
 0x235   : > { %v2962_v57 = vld [vmem:[%s210_s4] sm:$0x1] }
 0x236   : > { %v2963_v58 = vmul.f32 %v2962_v57, %v2962_v57 }
 0x238   : > { %v2964_v21 = vsel %vm2956_vm4, %v2963_v58, 0.0 }
 0x239   : > { %2965 = vadd.xlane.f32.xlu0 %v2964_v21 }
 0x2c6   : > { %v2966_v46 = vpop.xlane.xlu0 %2965 }
 0x2c7   : > { %v2967_v39 = vmax.f32 %v2966_v46, 1e-24 }
 0x2c9   : > { %4224 = vrsqrt.f32 %v2967_v39 }
 0x2d3   : > { %v4225_v55 = vpop.eup %4224 }
 0x2d4   : > { %v2969_v61 = vmul.f32 %v4225_v55, %v2962_v57 }
 0x2d6   : > { %2970 = vst.msk [vmem:[%s210_s4] sm:$0x1] %vm2956_vm4, %v2969_v61 }
 0x2d7 PF: > { %s3420_s5 = sshll.u32 %s4308_s16, 4  ;;  %s2984_s8 = sshll.u32 %s210_s4, 4  ;;  %s2985_s8 = int_to_ptr.vmem [resolvable:$true] %s2984_s8 }
 0x2d8   : > { %s5048_s15 = scalar_lea.hbm %s5100_s3, %s3420_s5  ;;  %s2972_s9 = scalar_lea.sflag [#allocation3], %s209_s29 }
 0x2d9   : > { %s4226_s10 = scalar_lea.vmem %s2985_s8, 16  ;;  %s4323_s11 = smov [#allocation2]  }
 0x2da   : > { %p4227_p2 = scmp.ne.s32.totalorder %s2985_s8, %s4226_s10  ;;  %s4230_s20 = sshll.u32 %s4323_s11, 4  ;;  %s4231_s20 = int_to_ptr.vmem [resolvable:$false] %s4230_s20 }
 0x2db   : > { %s4232_s21 = scalar_lea.vmem %s4231_s20, 32  ;;  %p4233_p6 = scmp.lt.s32.totalorder %s2985_s8, %s4231_s20 }
 0x2dc   : > { %p4228_p4 = pnand %p4227_p2, %p4393_p3  ;;  %p4234_p7 = scmp.lt.s32.totalorder %s4232_s21, %s4226_s10 }
 0x2de   : > { %p4229_p5 = pneg %p4228_p4  ;;  %p4235_p8 = por %p4234_p7, %p4233_p6 }
 0x2e0   : > { %p4236_p10 = pnand %p4235_p8, %p4229_p5 }
 0x2e2   : > { %4239 = shalt.err (!%p4236_p10)
}
 0x2e3   : > { %s4240_s16 = scalar_lea.hbm %s5048_s15, 16  ;;  %s4244_s27 = scalar_lea.hbm %s5100_s3, 32 }
 0x2e4   : > { %p4241_p11 = scmp.ne.s32.totalorder %s5048_s15, %s4240_s16  ;;  %p4245_p0 = scmp.lt.u32.totalorder %s5048_s15, %s5100_s3 }
 0x2e5   : > { %p4246_p1 = scmp.lt.u32.totalorder %s4244_s27, %s4240_s16  ;;  %p4248_p4 = scmp.lt.u32.totalorder %s4240_s16, %s5048_s15 }
 0x2e6   : > { %p4242_p12 = pnand %p4241_p11, %p4393_p3 }
 0x2e7   : > { %p4247_p2 = por %p4246_p1, %p4245_p0 }
 0x2e8   : > { %p4243_p13 = pneg %p4242_p12 }
 0x2e9   : > { %p4249_p5 = por %p4248_p4, %p4247_p2 }
 0x2eb   : > { %p4250_p6 = pnand %p4249_p5, %p4243_p13 }
 0x2ed   : > { %4253 = shalt.err (!%p4250_p6)
}
 0x2ee   : > { %4152 = dma.vmem_to_hbm [thread:$0]  (%p4393_p3), %s2985_s8, 16, %s5048_s15, %s2972_s9  }
 0x2ef PF: > { %p4158_p7 = scmp.ge.s32.totalorder %s4320_s19, 2  ;;  %s2996_s5 = sand.u32 1, %s4292_s12  }
 0x2f0   : > { %s2997_s6 = scalar_lea.sflag [#allocation3], %s2996_s5 }
 0x2f1   : > { %p4155_p8 = pnand %p4158_p7, %p4403_p9 }
 0x2f3   : > { %4287 = dma.done.wait (!%p4155_p8), %s2997_s6, 16  }
 0x2f4   : > { %4289 = vsyncadd (!%p4155_p8), %s2997_s6, 4294967280  ;;  %s16_s19 = sadd.s32 1, %s4320_s19   ;;  %s5103_s12 = smov %s4296_s13 }
 0x2f5   : > { %p13_p10 = scmp.ge.s32.totalorder %s16_s19, 6   ;;  %s5104_s13 = smov %s4300_s14 }
 0x2f6   : > { %s5105_s14 = smov %s4411_s28  ;;  %s5106_s15 = smov %s4312_s17 }
 0x2f7   : > { %s5107_s16 = smov %s4316_s18  ;;  %s5108_s17 = smov %s5111_s22 }
 0x2f8   : > { %s5109_s18 = smov %s5115_s23  ;;  %15 = sbr.rel (!%p13_p10) target bundleno = 5 (0x5), region = 83 }
 0x2ff   :  { %3001 = vsyncpa [#allocation3], 1 }
 0x300   :  { %3003 = vsyncpa [#allocation3 + $0x1], 1 }

</bundles_post_ra>
